<compile_context>
chip_gen: v7x
topology: tpu7x:2x2x1
jax: 0.10.0
libtpu: 0.0.40
codegen_flags: <defaults>
</compile_context>

<pallas_src>
import jax
import jax.numpy as jnp
from jax import lax
from jax.experimental import pallas as pl
from jax.experimental.pallas import tpu as pltpu

IN_FEATURES = 2048
OUT_FEATURES = 2048
EPS = 1e-12  # F.normalize default eps


# ---------------------------------------------------------------------------
# Fused kernel: y = x @ W^T + b, streamed over N; exact L2 norm in epilogue.
# Grid = (N // tn,). Output block index is constant over the grid, so the f32
# (B, N) output stays resident in VMEM and is filled one (B, tn) slice per step.
# ---------------------------------------------------------------------------
def _fused_mlp_l2norm_kernel(x_ref, w_ref, b_ref, o_ref):
    n = pl.program_id(0)
    tn = w_ref.shape[0]

    # (B, K) @ (tn, K)^T -> (B, tn); contraction on the last dim of both
    # operands (MXU transposed-weight push, no VMEM transpose of the tile).
    y = lax.dot_general(
        x_ref[...],
        w_ref[...],
        dimension_numbers=(((1,), (1,)), ((), ())),
        preferred_element_type=jnp.float32,
    )
    y = y + b_ref[...]  # (B, tn) + (1, tn)

    col = pl.multiple_of(n * tn, tn)
    o_ref[:, pl.ds(col, tn)] = y

    @pl.when(n == pl.num_programs(0) - 1)
    def _():
        full = o_ref[...]                                  # (B, N), all slices written
        sq = jnp.sum(full * full, axis=-1, keepdims=True)  # (B, 1)
        norm = jnp.maximum(jnp.sqrt(sq), EPS)              # exact sqrt (1e-5 budget)
        o_ref[...] = full / norm


def naver_mlp_test_forward(x, weight, bias, *, tn=256):
    """x: (B, 2048) f32; weight: (2048, 2048) native PyTorch (out, in); bias: (2048,)."""
    B, K = x.shape
    N, K_w = weight.shape
    assert K == IN_FEATURES and K_w == K and N == OUT_FEATURES
    assert N % tn == 0

    x = x.astype(jnp.float32)
    w = weight.astype(jnp.float32)
    b2 = bias.reshape(1, N).astype(jnp.float32)

    cost = pl.CostEstimate(
        flops=2 * B * K * N + 4 * B * N,            # matmul + bias/norm epilogue
        transcendentals=B,                          # per-row sqrt
        bytes_accessed=4 * (N * K + B * K + N + B * N),
    )

    return pl.pallas_call(
        _fused_mlp_l2norm_kernel,
        out_shape=jax.ShapeDtypeStruct((B, N), jnp.float32),
        grid_spec=pltpu.PrefetchScalarGridSpec(
            num_scalar_prefetch=0,
            grid=(N // tn,),
            in_specs=[
                pl.BlockSpec((B, K), lambda n: (0, 0)),    # x: resident (64 KiB @ B=8)
                pl.BlockSpec((tn, K), lambda n: (n, 0)),   # weight: contiguous (tn, K) rows
                pl.BlockSpec((1, tn), lambda n: (0, n)),   # bias slice
            ],
            out_specs=pl.BlockSpec((B, N), lambda n: (0, 0)),  # resident output
        ),
        compiler_params=pltpu.CompilerParams(
            dimension_semantics=("arbitrary",),  # output block shared across N steps
        ),
        cost_estimate=cost,
    )(x, w, b2)


def _reference(x, weight, bias):
    y = x @ weight.T + bias
    norm = jnp.maximum(jnp.sqrt(jnp.sum(y * y, axis=-1, keepdims=True)), EPS)
    return y / norm


if __name__ == "__main__":
    key = jax.random.PRNGKey(0)
    k_x, k_w, k_b = jax.random.split(key, 3)

    B = 8  # small batch; feature dims are fixed at 2048 by the module

    # Deterministic parameter init mimicking nn.Linear's U(-1/sqrt(K), 1/sqrt(K)).
    bound = 1.0 / (IN_FEATURES ** 0.5)
    weight = jax.random.uniform(
        k_w, (OUT_FEATURES, IN_FEATURES), jnp.float32, -bound, bound
    )
    bias = jax.random.uniform(k_b, (OUT_FEATURES,), jnp.float32, -bound, bound)

    x = jax.random.normal(k_x, (B, IN_FEATURES), jnp.float32)

    out = naver_mlp_test_forward(x, weight, bias)
    out = jax.block_until_ready(out)

    ref = _reference(x, weight, bias)
    assert out.shape == (B, OUT_FEATURES)
    assert jnp.allclose(out, ref, atol=1e-5, rtol=1e-5)

    print("KERNEL_OK")
</pallas_src>

<mosaic_0001>
module attributes {stable_mosaic.version = 11 : i64} {
  func.func @_fused_mlp_l2norm_kernel(%arg0: i32, %arg1: memref<8x2048xf32, #tpu.memory_space<vmem>>, %arg2: memref<256x2048xf32, #tpu.memory_space<vmem>>, %arg3: memref<1x256xf32, #tpu.memory_space<vmem>>, %arg4: memref<8x2048xf32, #tpu.memory_space<vmem>>) attributes {dimension_semantics = [#tpu.dimension_semantics<arbitrary>], iteration_bounds = array<i64: 8>, scalar_prefetch = 0 : i64, scratch_operands = 0 : i64, tpu.core_type = #tpu.core_type<tc>, window_params = [{pipeline_mode = #tpu.pipeline_mode<synchronous>, transform_indices = @transform_0, window_bounds = array<i64: 8, 2048>}, {transform_indices = @transform_1, window_bounds = array<i64: 256, 2048>}, {transform_indices = @transform_2, window_bounds = array<i64: 1, 256>}, {pipeline_mode = #tpu.pipeline_mode<synchronous>, transform_indices = @transform_3, window_bounds = array<i64: 8, 2048>}]} {
    %c0 = arith.constant 0 : index
    %c0_0 = arith.constant 0 : index
    %0 = vector.load %arg1[%c0, %c0_0] : memref<8x2048xf32, #tpu.memory_space<vmem>>, vector<8x2048xf32>
    %c0_1 = arith.constant 0 : index
    %c0_2 = arith.constant 0 : index
    %1 = vector.load %arg2[%c0_1, %c0_2] : memref<256x2048xf32, #tpu.memory_space<vmem>>, vector<256x2048xf32>
    %cst = arith.constant dense<0.000000e+00> : vector<8x256xf32>
    %2 = tpu.matmul %0, %1, %cst {dimension_numbers = #tpu.dot_dimension_numbers<[1], [1], [0], [0], [0, 0, 1, 0], [], []>} : vector<8x2048xf32>, vector<256x2048xf32>, vector<8x256xf32> -> vector<8x256xf32>
    %c0_3 = arith.constant 0 : index
    %c0_4 = arith.constant 0 : index
    %3 = vector.load %arg3[%c0_3, %c0_4] : memref<1x256xf32, #tpu.memory_space<vmem>>, vector<1x256xf32>
    %4 = vector.broadcast %3 : vector<1x256xf32> to vector<8x256xf32>
    %5 = arith.addf %2, %4 : vector<8x256xf32>
    %c256_i32 = arith.constant 256 : i32
    %6 = arith.muli %arg0, %c256_i32 : i32
    %7 = tpu.assume_multiple %6, 256 : i32
    %c0_5 = arith.constant 0 : index
    %8 = arith.index_cast %7 : i32 to index
    %9 = vector.load %arg4[%c0_5, %8] : memref<8x2048xf32, #tpu.memory_space<vmem>>, vector<8x256xf32>
    tpu.vector_store %arg4[%c0_5, %8], %5 {strides = array<i32>} : memref<8x2048xf32, #tpu.memory_space<vmem>>, vector<8x256xf32>,
    %c7_i32 = arith.constant 7 : i32
    %10 = arith.cmpi eq, %arg0, %c7_i32 : i32
    %11 = arith.extui %10 : i1 to i32
    %c0_i32 = arith.constant 0 : i32
    %12 = arith.cmpi ne, %11, %c0_i32 : i32
    scf.if %12 {
      %c0_6 = arith.constant 0 : index
      %c0_7 = arith.constant 0 : index
      %13 = vector.load %arg4[%c0_6, %c0_7] : memref<8x2048xf32, #tpu.memory_space<vmem>>, vector<8x2048xf32>
      %14 = arith.mulf %13, %13 : vector<8x2048xf32>
      %cst_8 = arith.constant dense<0.000000e+00> : vector<8xf32>
      %15 = vector.multi_reduction <add>, %14, %cst_8 [1] : vector<8x2048xf32> to vector<8xf32>
      %16 = vector.shape_cast %15 : vector<8xf32> to vector<8x1xf32>
      %17 = math.sqrt %16 : vector<8x1xf32>
      %cst_9 = arith.constant 9.99999996E-13 : f32
      %18 = vector.broadcast %cst_9 : f32 to vector<8x1xf32>
      %19 = arith.maximumf %17, %18 : vector<8x1xf32>
      %20 = vector.broadcast %19 : vector<8x1xf32> to vector<8x2048xf32>
      %21 = arith.divf %13, %20 : vector<8x2048xf32>
      %c0_10 = arith.constant 0 : index
      %c0_11 = arith.constant 0 : index
      %22 = vector.load %arg4[%c0_10, %c0_11] : memref<8x2048xf32, #tpu.memory_space<vmem>>, vector<8x2048xf32>
      tpu.vector_store %arg4[%c0_10, %c0_11], %21 {strides = array<i32>} : memref<8x2048xf32, #tpu.memory_space<vmem>>, vector<8x2048xf32>,
    } else {
    }
    return
  }
  func.func @transform_0(%arg0: i32) -> (i32, i32) {
    %c0_i32 = arith.constant 0 : i32
    %c0_i32_0 = arith.constant 0 : i32
    %c0_i32_1 = arith.constant 0 : i32
    return %c0_i32, %c0_i32_0 : i32, i32
  }
  func.func @transform_1(%arg0: i32) -> (i32, i32) {
    %c0_i32 = arith.constant 0 : i32
    %c0_i32_0 = arith.constant 0 : i32
    return %arg0, %c0_i32 : i32, i32
  }
  func.func @transform_2(%arg0: i32) -> (i32, i32) {
    %c0_i32 = arith.constant 0 : i32
    %c0_i32_0 = arith.constant 0 : i32
    return %c0_i32, %arg0 : i32, i32
  }
  func.func @transform_3(%arg0: i32) -> (i32, i32) {
    %c0_i32 = arith.constant 0 : i32
    %c0_i32_0 = arith.constant 0 : i32
    %c0_i32_1 = arith.constant 0 : i32
    return %c0_i32, %c0_i32_0 : i32, i32
  }
}

</mosaic_0001>

<bundles_post_ra>
// kernel: tpu_custom_call.1
= control target key start
LH: loop header
LB: loop body
LE: loop exit
PB: predicated region body
PF: predicated region fallthrough
CT: control target
= control target key end

     0   :  { %8 = vsyncpa [#allocation3], 0  ;;  %s3054_s0 = inlined_call_operand.hbm [shape: f32[8,2048], index: 0, kind: input, shape index: {}]   ;;  %s3055_s1 = inlined_call_operand.hbm [shape: f32[2048,2048], index: 1, kind: input, shape index: {}]   ;;  %s3056_s2 = inlined_call_operand.hbm [shape: f32[1,2048], index: 2, kind: input, shape index: {}]   ;;  %s3057_s3 = inlined_call_operand.hbm [shape: f32[8,2048], index: 3, kind: output, shape index: {}]  }
   0x1   :  { %9 = vsyncpa [#allocation6], 0 }
   0x2   :  { %11 = vsyncpa [#allocation6 + $0x1], 0 }
   0x3   :  { %12 = vsyncpa [#allocation4], 0  ;;  %s2333_s12 = smov 0   ;;  %s2335_s13 = smov 0  }
   0x4   :  { %s2337_s14 = smov 0   ;;  %s2339_s15 = smov 0  }
   0x5 LB: > { %s2354_s16 = sadd.s32 1, %s2305_s15   ;;  %s46_s17 = sadd.s32 1, %s2301_s14  ;;  %s2305_s15 = sphi %s2339_s15, %s3078_s15   ;;  %s2301_s14 = sphi %s2337_s14, %s3077_s14   ;;  %s2297_s13 = sphi %s2335_s13, %s3076_s13   ;;  %s2293_s12 = sphi %s2333_s12, %s3075_s12  }
   0x6   : > { %s43_s18 = ssub.s32 %s2305_s15, %s2354_s16  ;;  %p53_p0 = scmp.ne.s32.totalorder %s2301_s14, %s2297_s13 }
   0x7   : > { %p44_p1 = scmp.eq.s32.totalorder %s43_s18, 0  ;;  %p54_p2 = scmp.eq.s32.totalorder %s2305_s15, 0 }
   0x8   : > { %p2105_p3 = scmp.lt.s32.totalorder %s2305_s15, 8  ;;  %s141_s20 = sand.u32 1, %s2305_s15  }
   0x9   : > { %s2364_s19 = scalar_select %p44_p1, %s2301_s14, %s46_s17  }
   0xa   : > { %p55_p4 = por %p54_p2, %p53_p0  ;;  %s143_s21 = sand.u32 1, %s2301_s14  }
   0xb   : > { %s1532_s22 = sshll.u32 %s143_s21, 12  ;;  %s1551_s23 = sshll.u32 %s2305_s15, 16 }
   0xc   : > { %s2374_s26 = scalar_lea.hbm %s3055_s1, %s1551_s23  ;;  %s145_s27 = scalar_lea.vmem [#allocation5], %s1532_s22 }
   0xd   : > { %s153_s28 = sshll.u32 %s145_s27, 4  ;;  %p2376_p5 = pnand %p2105_p3, %p55_p4  ;;  %s2380_s28 = int_to_ptr.vmem [resolvable:$true] %s153_s28 }
   0xe   : > { %s2382_s30 = scalar_lea.sflag [#allocation6], %s141_s20  ;;  %s2149_s4 = scalar_lea.hbm %s2374_s26, 65536 }
   0xf   : > { %s3064_s29 = scalar_select %p2376_p5, 1, 0 }
  0x10   : > { %p2150_p6 = scmp.ne.s32.totalorder %s2374_s26, %s2149_s4  ;;  %p3059_p7 = pneg %p2376_p5 }
  0x11   : > { %s2154_s7 = scalar_lea.hbm %s3055_s1, 524288  ;;  %p2155_p10 = scmp.lt.u32.totalorder %s2374_s26, %s3055_s1 }
  0x12   : > { %p2152_p8 = pnand %p3059_p7, %p2150_p6  ;;  %p2156_p11 = scmp.lt.u32.totalorder %s2154_s7, %s2149_s4 }
  0x13   : > { %p2158_p13 = scmp.lt.u32.totalorder %s2149_s4, %s2374_s26 }
  0x14   : > { %p2153_p9 = pneg %p2152_p8  ;;  %p2157_p12 = por %p2156_p11, %p2155_p10 }
  0x16   : > { %p2159_p0 = por %p2158_p13, %p2157_p12 }
  0x18   : > { %p2160_p1 = pnand %p2159_p0, %p2153_p9 }
  0x1a   : > { %2163 = shalt.err (!%p2160_p1)
}
  0x1b   : > { %s2164_s10 = scalar_lea.vmem %s2380_s28, 65536  ;;  %s2307_s11 = smov [#allocation5]  }
  0x1c   : > { %p2165_p2 = scmp.ne.s32.totalorder %s2380_s28, %s2164_s10  ;;  %s2169_s17 = sshll.u32 %s2307_s11, 4  ;;  %s2170_s17 = int_to_ptr.vmem [resolvable:$false] %s2169_s17 }
  0x1d   : > { %s2171_s18 = scalar_lea.vmem %s2170_s17, 131072  ;;  %p2172_p6 = scmp.lt.s32.totalorder %s2380_s28, %s2170_s17 }
  0x1e   : > { %p2167_p3 = pnand %p2165_p2, %p3059_p7  ;;  %p2173_p8 = scmp.lt.s32.totalorder %s2171_s18, %s2164_s10 }
  0x20   : > { %p2168_p4 = pneg %p2167_p3  ;;  %p2174_p10 = por %p2173_p8, %p2172_p6 }
  0x22   : > { %p2175_p11 = pnand %p2174_p10, %p2168_p4 }
  0x24   : > { %2178 = shalt.err (!%p2175_p11)
}
  0x25   : > { %s2308_s20 = smov 2048   ;;  %s2309_s22 = smov 128  }
  0x26   : > { %2100 = dma.hbm_to_vmem [thread:$0]  (!%p2376_p5), %s2374_s26, 65536, %s2380_s28, %s2382_s30, %s2308_s20, %s2308_s20, %s2309_s22  }
  0x27   : > { %s2411_s23 = sadd.s32 4294967295, %s2305_s15   ;;  %p59_p12 = scmp.ne.s32.totalorder %s2297_s13, %s2293_s12 }
  0x28   : > { %p3058_p9 = scmp.eq.s32.totalorder %s2411_s23, 0  ;;  %p1529_p13 = scmp.ge.s32.totalorder %s2305_s15, 1 }
  0x29   : > { %p117_p0 = scmp.lt.s32.totalorder %s2305_s15, 9  ;;  %s2310_s26 = smov [#allocation2]  }
  0x2a   : > { %p2420_p1 = por %p3058_p9, %p59_p12  ;;  %s130_s27 = sshll.u32 %s2310_s26, 4  ;;  %s131_s27 = int_to_ptr.vmem [resolvable:$true] %s130_s27 }
  0x2b   : > { %p2424_p2 = pnand %p1529_p13, %p117_p0  ;;  %s1536_s28 = sshll.u32 %s143_s21, 1 }
  0x2c   : > { %s3065_s24 = scalar_select %p2420_p1, 1, 0 }
  0x2d   : > { %s3066_s25 = scalar_select %p2424_p2, 1, 0 }
  0x2e   : > { %p2093_p3 = pneg %p2424_p2  ;;  %s1552_s4 = sshll.u32 %s2305_s15, 5 }
  0x2f   : > { %s167_s12 = scalar_lea.vmem [#allocation7], %s1536_s28  ;;  %s2442_s9 = scalar_lea.hbm %s3056_s2, %s1552_s4 }
  0x30   : > { %s175_s5 = sshll.u32 %s167_s12, 4  ;;  %p2435_p4 = pnand %p2093_p3, %p3058_p9  ;;  %s2444_s5 = int_to_ptr.vmem [resolvable:$true] %s175_s5 }
  0x31   : > { %s2179_s15 = scalar_lea.hbm %s3054_s0, 2048 }
  0x32   : > { %p2180_p6 = scmp.ne.s32.totalorder %s3054_s0, %s2179_s15  ;;  %p2181_p8 = pneg %p2435_p4 }
  0x33   : > { %p2186_p12 = scmp.lt.u32.totalorder %s2179_s15, %s3054_s0 }
  0x34   : > { %p2182_p10 = pnand %p2181_p8, %p2180_p6 }
  0x36   : > { %p2183_p11 = pneg %p2182_p10 }
  0x38   : > { %p2188_p13 = pnand %p2186_p12, %p2183_p11 }
  0x3a   : > { %2191 = shalt.err (!%p2188_p13)
}
  0x3b   : > { %s2192_s22 = scalar_lea.vmem %s131_s27, 2048  ;;  %p2200_p7 = scmp.lt.s32.totalorder %s131_s27, %s131_s27 }
  0x3c   : > { %p2193_p0 = scmp.ne.s32.totalorder %s131_s27, %s2192_s22  ;;  %p2201_p1 = scmp.lt.s32.totalorder %s2192_s22, %s2192_s22 }
  0x3e   : > { %p2195_p3 = pnand %p2193_p0, %p2181_p8  ;;  %p2202_p2 = por %p2201_p1, %p2200_p7 }
  0x40   : > { %p2196_p9 = pneg %p2195_p3 }
  0x42   : > { %p2203_p5 = pnand %p2202_p2, %p2196_p9 }
  0x44   : > { %2206 = shalt.err (!%p2203_p5)
}
  0x45   : > { %2096 = dma.hbm_to_vmem [thread:$0]  (!%p2435_p4), %s3054_s0, 2048, %s131_s27, [#allocation3]  }
  0x46   : > { %s2207_s4 = scalar_lea.hbm %s2442_s9, 32  ;;  %p3068_p8 = scmp.ne.s32.totalorder %s3064_s29, 0 }
  0x47   : > { %p2208_p6 = scmp.ne.s32.totalorder %s2442_s9, %s2207_s4  ;;  %s2212_s8 = scalar_lea.hbm %s3056_s2, 256 }
  0x48   : > { %p3069_p10 = pneg %p3068_p8  ;;  %p2213_p5 = scmp.lt.u32.totalorder %s2442_s9, %s3056_s2 }
  0x49   : > { %p2214_p7 = scmp.lt.u32.totalorder %s2212_s8, %s2207_s4  ;;  %p2216_p1 = scmp.lt.u32.totalorder %s2207_s4, %s2442_s9 }
  0x4a   : > { %p2210_p11 = pnand %p2208_p6, %p3069_p10 }
  0x4b   : > { %p2215_p9 = por %p2214_p7, %p2213_p5 }
  0x4c   : > { %p2211_p12 = pneg %p2210_p11 }
  0x4d   : > { %p2217_p2 = por %p2216_p1, %p2215_p9 }
  0x4f   : > { %p2218_p13 = pnand %p2217_p2, %p2211_p12 }
  0x51   : > { %2221 = shalt.err (!%p2218_p13)
}
  0x52   : > { %s2222_s27 = scalar_lea.vmem %s2444_s5, 32  ;;  %p3070_p0 = pmov %p3069_p10 }
  0x53   : > { %p2223_p4 = scmp.ne.s32.totalorder %s2444_s5, %s2222_s27  ;;  %s2311_s10 = smov [#allocation7]  }
  0x54   : > { %s2227_s15 = sshll.u32 %s2311_s10, 4  ;;  %s2228_s15 = int_to_ptr.vmem [resolvable:$false] %s2227_s15 }
  0x55   : > { %p2225_p3 = pnand %p2223_p4, %p3070_p0  ;;  %s2229_s11 = scalar_lea.vmem %s2228_s15, 64 }
  0x56   : > { %p2230_p10 = scmp.lt.s32.totalorder %s2444_s5, %s2228_s15  ;;  %p2231_p11 = scmp.lt.s32.totalorder %s2229_s11, %s2222_s27 }
  0x57   : > { %p2226_p6 = pneg %p2225_p3 }
  0x58   : > { %p2232_p5 = por %p2231_p11, %p2230_p10 }
  0x5a   : > { %p2233_p7 = pnand %p2232_p5, %p2226_p6 }
  0x5c   : > { %2236 = shalt.err (!%p2233_p7)
}
  0x5d   : > { %2103 = dma.hbm_to_vmem [thread:$0]  (!%p3068_p8), %s2442_s9, 32, %s2444_s5, %s2382_s30  }
  0x5e   : > { %p3071_p12 = scmp.ne.s32.totalorder %s3066_s25, 0 }
  0x5f   : > { %p3072_p9 = scmp.eq.s32.totalorder (!%p3071_p12), %s2411_s23, 0 }
  0x60   : > { %184 = sbr.rel (%p3071_p12) target bundleno = 1088 (0x440), region = 32 }
  0x67   : > { %2280 = dma.done.wait (%p3072_p9), [#allocation3], 2048   ;;  %p3073_p1 = pmov %p3072_p9 }
  0x68   : > { %s190_s17 = sand.u32 1, %s2411_s23   ;;  %s192_s18 = sand.u32 1, %s2297_s13  }
  0x69   : > { %2282 = vsyncadd (%p3073_p1), [#allocation3], 4294965248  ;;  %s1541_s29 = sshll.u32 %s192_s18, 12  ;;  %s191_s20 = scalar_lea.sflag [#allocation6], %s190_s17 }
  0x6a   : > { %s2496_s22 = scalar_lea.vmem [#allocation5], %s1541_s29  ;;  %p3074_p8 = scmp.ne.s32.totalorder %s3065_s24, 0 }
  0x6c   : > { %2284 = dma.done.wait (%p3074_p8), %s191_s20, 65568  }
  0x6d   : > { %2286 = vsyncadd (%p3074_p8), %s191_s20, 4294901728  ;;  %v245_v0 = vld [vmem:[%s2496_s22 + $0x8] sm:$0xff]  ;;  %v244_v5 = vld [vmem:[%s2496_s22] sm:$0xff]  ;;  %s1542_s30 = sshll.u32 %s192_s18, 1  ;;  %s1543_s24 = sshll.u32 %s2411_s23, 8 }
  0x6e   : > { %v261_v1 = vld [vmem:[%s2496_s22 + $0x88] sm:$0xff]  ;;  %v260_v6 = vld [vmem:[%s2496_s22 + $0x80] sm:$0xff]  ;;  %s203_s25 = scalar_lea.vmem [#allocation7], %s1542_s30  ;;  %s1337_s5 = sshra.s32 %s1543_s24, 7 }
  0x6f   : > { %v253_v2 = vld [vmem:[%s2496_s22 + $0x48] sm:$0xff]  ;;  %v1553_v3 = vpack.c.bf16 %v261_v1, %v245_v0  ;;  %v1555_v8 = vpack.c.bf16 %v260_v6, %v244_v5  ;;  %v252_v9 = vld [vmem:[%s2496_s22 + $0x40] sm:$0xff]  ;;  %s1544_s9 = sshll.u32 %s1337_s5, 3  ;;  %p1545_p2 = scmp.ne.s32.totalorder %s2411_s23, 7 }
  0x70   : > { %v269_v4 = vld [vmem:[%s2496_s22 + $0xc8] sm:$0xff]  ;;  %v268_v10 = vld [vmem:[%s2496_s22 + $0xc0] sm:$0xff]  ;;  %s1340_s26 = scalar_lea.vmem [#allocation8], %s1544_s9 }
  0x71   : > { %v1809_v7 = vpack.c.bf16 %v269_v4, %v253_v2  ;;  %v277_v11 = vld [vmem:[%s2496_s22 + $0x108] sm:$0xff]  ;;  %1554 = vmatprep.subr.bf16.mxu1 %v1553_v3  ;;  %v1811_v12 = vpack.c.bf16 %v268_v10, %v252_v9  ;;  %v276_v18 = vld [vmem:[%s2496_s22 + $0x100] sm:$0xff] }
  0x72   : > { %v293_v13 = vld [vmem:[%s2496_s22 + $0x188] sm:$0xff]  ;;  %1556 = vmatpush1.bf16.xpose.msra.mxu1 %v1555_v8  ;;  %v292_v19 = vld [vmem:[%s2496_s22 + $0x180] sm:$0xff] }
  0x73   : > { %v285_v14 = vld [vmem:[%s2496_s22 + $0x148] sm:$0xff]  ;;  %1810 = vmatprep.subr.bf16.mxu0 %v1809_v7  ;;  %v1557_v16 = vpack.c.bf16 %v293_v13, %v277_v11  ;;  %v284_v20 = vld [vmem:[%s2496_s22 + $0x140] sm:$0xff]  ;;  %v1559_v26 = vpack.c.bf16 %v292_v19, %v276_v18 }
  0x74   : > { %v301_v15 = vld [vmem:[%s2496_s22 + $0x1c8] sm:$0xff]  ;;  %1812 = vmatpush1.bf16.xpose.msra.mxu0 %v1811_v12  ;;  %v300_v21 = vld [vmem:[%s2496_s22 + $0x1c0] sm:$0xff] }
  0x75   : > { %v1813_v17 = vpack.c.bf16 %v301_v15, %v285_v14  ;;  %1558 = vmatprep.subr.bf16.mxu1 %v1557_v16  ;;  %v309_v22 = vld [vmem:[%s2496_s22 + $0x208] sm:$0xff]  ;;  %v1815_v27 = vpack.c.bf16 %v300_v21, %v284_v20  ;;  %v308_v30 = vld [vmem:[%s2496_s22 + $0x200] sm:$0xff] }
  0x76   : > { %v325_v23 = vld [vmem:[%s2496_s22 + $0x288] sm:$0xff]  ;;  %v324_v31 = vld [vmem:[%s2496_s22 + $0x280] sm:$0xff] }
  0x77   : > { %1814 = vmatprep.subr.bf16.mxu0 %v1813_v17  ;;  %v317_v24 = vld [vmem:[%s2496_s22 + $0x248] sm:$0xff]  ;;  %v1561_v28 = vpack.c.bf16 %v325_v23, %v309_v22  ;;  %v316_v32 = vld [vmem:[%s2496_s22 + $0x240] sm:$0xff]  ;;  %v1563_v38 = vpack.c.bf16 %v324_v31, %v308_v30 }
  0x78   : > { %v333_v25 = vld [vmem:[%s2496_s22 + $0x2c8] sm:$0xff]  ;;  %v332_v33 = vld [vmem:[%s2496_s22 + $0x2c0] sm:$0xff] }
  0x79   : > { %v1817_v29 = vpack.c.bf16 %v333_v25, %v317_v24  ;;  %v341_v34 = vld [vmem:[%s2496_s22 + $0x308] sm:$0xff]  ;;  %v1819_v39 = vpack.c.bf16 %v332_v33, %v316_v32  ;;  %v340_v42 = vld [vmem:[%s2496_s22 + $0x300] sm:$0xff] }
  0x7a   : > { %1560 = vmatpush1.bf16.xpose.msra.mxu1 %v1559_v26  ;;  %v357_v35 = vld [vmem:[%s2496_s22 + $0x388] sm:$0xff]  ;;  %v356_v43 = vld [vmem:[%s2496_s22 + $0x380] sm:$0xff] }
  0x7b   : > { %1562 = vmatprep.subr.bf16.mxu1 %v1561_v28  ;;  %v349_v36 = vld [vmem:[%s2496_s22 + $0x348] sm:$0xff]  ;;  %v1565_v40 = vpack.c.bf16 %v357_v35, %v341_v34  ;;  %v348_v44 = vld [vmem:[%s2496_s22 + $0x340] sm:$0xff]  ;;  %v1567_v50 = vpack.c.bf16 %v356_v43, %v340_v42 }
  0x7c   : > { %1816 = vmatpush1.bf16.xpose.msra.mxu0 %v1815_v27  ;;  %v365_v37 = vld [vmem:[%s2496_s22 + $0x3c8] sm:$0xff]  ;;  %v364_v45 = vld [vmem:[%s2496_s22 + $0x3c0] sm:$0xff] }
  0x7d   : > { %1818 = vmatprep.subr.bf16.mxu0 %v1817_v29  ;;  %v1821_v41 = vpack.c.bf16 %v365_v37, %v349_v36  ;;  %v373_v46 = vld [vmem:[%s2496_s22 + $0x408] sm:$0xff]  ;;  %v1823_v51 = vpack.c.bf16 %v364_v45, %v348_v44  ;;  %v372_v54 = vld [vmem:[%s2496_s22 + $0x400] sm:$0xff] }
  0x7e   : > { %v389_v47 = vld [vmem:[%s2496_s22 + $0x488] sm:$0xff]  ;;  %v388_v55 = vld [vmem:[%s2496_s22 + $0x480] sm:$0xff] }
  0x7f   : > { %v381_v48 = vld [vmem:[%s2496_s22 + $0x448] sm:$0xff]  ;;  %v1569_v52 = vpack.c.bf16 %v389_v47, %v373_v46  ;;  %v380_v56 = vld [vmem:[%s2496_s22 + $0x440] sm:$0xff]  ;;  %v1571_v62 = vpack.c.bf16 %v388_v55, %v372_v54 }
  0x80   : > { %v397_v49 = vld [vmem:[%s2496_s22 + $0x4c8] sm:$0xff]  ;;  %v396_v57 = vld [vmem:[%s2496_s22 + $0x4c0] sm:$0xff] }
  0x81   : > { %v1825_v53 = vpack.c.bf16 %v397_v49, %v381_v48  ;;  %v405_v58 = vld [vmem:[%s2496_s22 + $0x508] sm:$0xff]  ;;  %v1827_v63 = vpack.c.bf16 %v396_v57, %v380_v56  ;;  %v404_v2 = vld [vmem:[%s2496_s22 + $0x500] sm:$0xff] }
  0x82   : > { %1564 = vmatpush1.bf16.xpose.msra.mxu1 %v1563_v38  ;;  %v421_v59 = vld [vmem:[%s2496_s22 + $0x588] sm:$0xff]  ;;  %v420_v3 = vld [vmem:[%s2496_s22 + $0x580] sm:$0xff] }
  0x83   : > { %1566 = vmatprep.subr.bf16.mxu1 %v1565_v40  ;;  %v413_v60 = vld [vmem:[%s2496_s22 + $0x548] sm:$0xff]  ;;  %v1573_v0 = vpack.c.bf16 %v421_v59, %v405_v58  ;;  %v412_v4 = vld [vmem:[%s2496_s22 + $0x540] sm:$0xff]  ;;  %v1575_v10 = vpack.c.bf16 %v420_v3, %v404_v2 }
  0x84   : > { %1820 = vmatpush1.bf16.xpose.msra.mxu0 %v1819_v39  ;;  %v429_v61 = vld [vmem:[%s2496_s22 + $0x5c8] sm:$0xff]  ;;  %v428_v5 = vld [vmem:[%s2496_s22 + $0x5c0] sm:$0xff] }
  0x85   : > { %1822 = vmatprep.subr.bf16.mxu0 %v1821_v41  ;;  %v1829_v1 = vpack.c.bf16 %v429_v61, %v413_v60  ;;  %v437_v6 = vld [vmem:[%s2496_s22 + $0x608] sm:$0xff]  ;;  %v1831_v11 = vpack.c.bf16 %v428_v5, %v412_v4  ;;  %v436_v16 = vld [vmem:[%s2496_s22 + $0x600] sm:$0xff] }
  0x86   : > { %v453_v7 = vld [vmem:[%s2496_s22 + $0x688] sm:$0xff]  ;;  %v452_v17 = vld [vmem:[%s2496_s22 + $0x680] sm:$0xff] }
  0x87   : > { %v445_v8 = vld [vmem:[%s2496_s22 + $0x648] sm:$0xff]  ;;  %v1577_v12 = vpack.c.bf16 %v453_v7, %v437_v6  ;;  %v444_v18 = vld [vmem:[%s2496_s22 + $0x640] sm:$0xff]  ;;  %v1579_v24 = vpack.c.bf16 %v452_v17, %v436_v16 }
  0x88   : > { %v461_v9 = vld [vmem:[%s2496_s22 + $0x6c8] sm:$0xff]  ;;  %v460_v19 = vld [vmem:[%s2496_s22 + $0x6c0] sm:$0xff] }
  0x89   : > { %v1833_v13 = vpack.c.bf16 %v461_v9, %v445_v8  ;;  %v229_v14 = vld [vmem:[#allocation2 + $0x8] sm:$0xff]  ;;  %v1835_v25 = vpack.c.bf16 %v460_v19, %v444_v18  ;;  %v468_v28 = vld [vmem:[%s2496_s22 + $0x700] sm:$0xff] }
  0x8a   : > { %1568 = vmatpush1.bf16.xpose.msra.mxu1 %v1567_v50  ;;  %832 = vmatprep.mubr.f32.mxu1 %v229_v14  ;;  %v237_v15 = vld [vmem:[#allocation2 + $0x48] sm:$0xff]  ;;  %v484_v29 = vld [vmem:[%s2496_s22 + $0x780] sm:$0xff] }
  0x8b   : > { %1570 = vmatprep.subr.bf16.mxu1 %v1569_v52  ;;  %1116 = vmatprep.mubr.f32.mxu0 %v237_v15  ;;  %v469_v20 = vld [vmem:[%s2496_s22 + $0x708] sm:$0xff]  ;;  %v476_v30 = vld [vmem:[%s2496_s22 + $0x740] sm:$0xff]  ;;  %v1583_v36 = vpack.c.bf16 %v484_v29, %v468_v28 }
  0x8c   : > { %1824 = vmatpush1.bf16.xpose.msra.mxu0 %v1823_v51  ;;  %v485_v21 = vld [vmem:[%s2496_s22 + $0x788] sm:$0xff]  ;;  %v492_v31 = vld [vmem:[%s2496_s22 + $0x7c0] sm:$0xff] }
  0x8d   : > { %1826 = vmatprep.subr.bf16.mxu0 %v1825_v53  ;;  %v477_v22 = vld [vmem:[%s2496_s22 + $0x748] sm:$0xff]  ;;  %v1581_v26 = vpack.c.bf16 %v485_v21, %v469_v20  ;;  %v1839_v37 = vpack.c.bf16 %v492_v31, %v476_v30  ;;  %v500_v40 = vld [vmem:[%s2496_s22 + $0x800] sm:$0xff] }
  0x8e   : > { %v493_v23 = vld [vmem:[%s2496_s22 + $0x7c8] sm:$0xff]  ;;  %v516_v41 = vld [vmem:[%s2496_s22 + $0x880] sm:$0xff] }
  0x8f   : > { %v1837_v27 = vpack.c.bf16 %v493_v23, %v477_v22  ;;  %v501_v32 = vld [vmem:[%s2496_s22 + $0x808] sm:$0xff]  ;;  %v508_v42 = vld [vmem:[%s2496_s22 + $0x840] sm:$0xff]  ;;  %v1587_v48 = vpack.c.bf16 %v516_v41, %v500_v40 }
  0x90   : > { %v517_v33 = vld [vmem:[%s2496_s22 + $0x888] sm:$0xff]  ;;  %v524_v43 = vld [vmem:[%s2496_s22 + $0x8c0] sm:$0xff] }
  0x91   : > { %v509_v34 = vld [vmem:[%s2496_s22 + $0x848] sm:$0xff]  ;;  %v1585_v38 = vpack.c.bf16 %v517_v33, %v501_v32  ;;  %v1843_v49 = vpack.c.bf16 %v524_v43, %v508_v42  ;;  %v532_v52 = vld [vmem:[%s2496_s22 + $0x900] sm:$0xff] }
  0x92   : > { %1572 = vmatpush1.bf16.xpose.msra.mxu1 %v1571_v62  ;;  %v525_v35 = vld [vmem:[%s2496_s22 + $0x8c8] sm:$0xff]  ;;  %v548_v53 = vld [vmem:[%s2496_s22 + $0x980] sm:$0xff] }
  0x93   : > { %1574 = vmatprep.subr.bf16.mxu1 %v1573_v0  ;;  %v1841_v39 = vpack.c.bf16 %v525_v35, %v509_v34  ;;  %v533_v44 = vld [vmem:[%s2496_s22 + $0x908] sm:$0xff]  ;;  %v540_v54 = vld [vmem:[%s2496_s22 + $0x940] sm:$0xff]  ;;  %v1591_v60 = vpack.c.bf16 %v548_v53, %v532_v52 }
  0x94   : > { %1828 = vmatpush1.bf16.xpose.msra.mxu0 %v1827_v63  ;;  %v549_v45 = vld [vmem:[%s2496_s22 + $0x988] sm:$0xff]  ;;  %v556_v55 = vld [vmem:[%s2496_s22 + $0x9c0] sm:$0xff] }
  0x95   : > { %1830 = vmatprep.subr.bf16.mxu0 %v1829_v1  ;;  %v541_v46 = vld [vmem:[%s2496_s22 + $0x948] sm:$0xff]  ;;  %v1589_v50 = vpack.c.bf16 %v549_v45, %v533_v44  ;;  %v1847_v61 = vpack.c.bf16 %v556_v55, %v540_v54  ;;  %v564_v0 = vld [vmem:[%s2496_s22 + $0xa00] sm:$0xff] }
  0x96   : > { %v557_v47 = vld [vmem:[%s2496_s22 + $0x9c8] sm:$0xff]  ;;  %v580_v1 = vld [vmem:[%s2496_s22 + $0xa80] sm:$0xff] }
  0x97   : > { %v1845_v51 = vpack.c.bf16 %v557_v47, %v541_v46  ;;  %v565_v56 = vld [vmem:[%s2496_s22 + $0xa08] sm:$0xff]  ;;  %v572_v2 = vld [vmem:[%s2496_s22 + $0xa40] sm:$0xff]  ;;  %v1595_v8 = vpack.c.bf16 %v580_v1, %v564_v0  ;;  %v247_v0 = vld [vmem:[%s2496_s22 + $0x18] sm:$0xff] }
  0x98   : > { %v581_v57 = vld [vmem:[%s2496_s22 + $0xa88] sm:$0xff]  ;;  %v588_v3 = vld [vmem:[%s2496_s22 + $0xac0] sm:$0xff]  ;;  %v263_v1 = vld [vmem:[%s2496_s22 + $0x98] sm:$0xff] }
  0x99   : > { %v573_v58 = vld [vmem:[%s2496_s22 + $0xa48] sm:$0xff]  ;;  %v1593_v62 = vpack.c.bf16 %v581_v57, %v565_v56  ;;  %v1851_v9 = vpack.c.bf16 %v588_v3, %v572_v2  ;;  %v604_v14 = vld [vmem:[%s2496_s22 + $0xb40] sm:$0xff]  ;;  %v255_v2 = vld [vmem:[%s2496_s22 + $0x58] sm:$0xff] }
  0x9a   : > { %1576 = vmatpush1.bf16.xpose.msra.mxu1 %v1575_v10  ;;  %v589_v59 = vld [vmem:[%s2496_s22 + $0xac8] sm:$0xff]  ;;  %v620_v15 = vld [vmem:[%s2496_s22 + $0xbc0] sm:$0xff]  ;;  %v271_v3 = vld [vmem:[%s2496_s22 + $0xd8] sm:$0xff] }
  0x9b   : > { %1578 = vmatprep.subr.bf16.mxu1 %v1577_v12  ;;  %v1849_v63 = vpack.c.bf16 %v589_v59, %v573_v58  ;;  %v597_v4 = vld [vmem:[%s2496_s22 + $0xb08] sm:$0xff]  ;;  %v596_v12 = vld [vmem:[%s2496_s22 + $0xb00] sm:$0xff]  ;;  %v1855_v21 = vpack.c.bf16 %v620_v15, %v604_v14  ;;  %v287_v14 = vld [vmem:[%s2496_s22 + $0x158] sm:$0xff] }
  0x9c   : > { %1832 = vmatpush1.bf16.xpose.msra.mxu0 %v1831_v11  ;;  %v613_v5 = vld [vmem:[%s2496_s22 + $0xb88] sm:$0xff]  ;;  %v303_v15 = vld [vmem:[%s2496_s22 + $0x1d8] sm:$0xff] }
  0x9d   : > { %1834 = vmatprep.subr.bf16.mxu0 %v1833_v13  ;;  %v605_v6 = vld [vmem:[%s2496_s22 + $0xb48] sm:$0xff]  ;;  %v1597_v10 = vpack.c.bf16 %v613_v5, %v597_v4  ;;  %v612_v13 = vld [vmem:[%s2496_s22 + $0xb80] sm:$0xff] }
  0x9e   : > { %v621_v7 = vld [vmem:[%s2496_s22 + $0xbc8] sm:$0xff]  ;;  %v1599_v20 = vpack.c.bf16 %v612_v13, %v596_v12  ;;  %v279_v12 = vld [vmem:[%s2496_s22 + $0x118] sm:$0xff] }
  0x9f   : > { %v1853_v11 = vpack.c.bf16 %v621_v7, %v605_v6  ;;  %v629_v16 = vld [vmem:[%s2496_s22 + $0xc08] sm:$0xff]  ;;  %v1617_v6 = vpack.c.bf16 %v263_v1, %v247_v0  ;;  %v1873_v7 = vpack.c.bf16 %v271_v3, %v255_v2  ;;  %v295_v13 = vld [vmem:[%s2496_s22 + $0x198] sm:$0xff] }
  0xa0   : > { %v645_v17 = vld [vmem:[%s2496_s22 + $0xc88] sm:$0xff]  ;;  %v407_v0 = vld [vmem:[%s2496_s22 + $0x518] sm:$0xff] }
  0xa1   : > { %v637_v18 = vld [vmem:[%s2496_s22 + $0xc48] sm:$0xff]  ;;  %v1601_v22 = vpack.c.bf16 %v645_v17, %v629_v16  ;;  %v228_v16 = vld [vmem:[#allocation2] sm:$0xff]  ;;  %v423_v1 = vld [vmem:[%s2496_s22 + $0x598] sm:$0xff] }
  0xa2   : > { %1580 = vmatpush1.bf16.xpose.msra.mxu1 %v1579_v24  ;;  %v653_v19 = vld [vmem:[%s2496_s22 + $0xcc8] sm:$0xff]  ;;  %v628_v24 = vld [vmem:[%s2496_s22 + $0xc00] sm:$0xff]  ;;  %v415_v2 = vld [vmem:[%s2496_s22 + $0x558] sm:$0xff] }
  0xa3   : > { %1582 = vmatprep.subr.bf16.mxu1 %v1581_v26  ;;  %v1857_v23 = vpack.c.bf16 %v653_v19, %v637_v18  ;;  %v636_v26 = vld [vmem:[%s2496_s22 + $0xc40] sm:$0xff]  ;;  %v661_v28 = vld [vmem:[%s2496_s22 + $0xd08] sm:$0xff]  ;;  %v431_v3 = vld [vmem:[%s2496_s22 + $0x5d8] sm:$0xff] }
  0xa4   : > { %1836 = vmatpush1.bf16.xpose.msra.mxu0 %v1835_v25  ;;  %v644_v25 = vld [vmem:[%s2496_s22 + $0xc80] sm:$0xff]  ;;  %v677_v29 = vld [vmem:[%s2496_s22 + $0xd88] sm:$0xff] }
  0xa5   : > { %1838 = vmatprep.subr.bf16.mxu0 %v1837_v27  ;;  %v652_v27 = vld [vmem:[%s2496_s22 + $0xcc0] sm:$0xff]  ;;  %v669_v30 = vld [vmem:[%s2496_s22 + $0xd48] sm:$0xff]  ;;  %v1603_v32 = vpack.c.bf16 %v644_v25, %v628_v24  ;;  %v1605_v34 = vpack.c.bf16 %v677_v29, %v661_v28  ;;  %v278_v24 = vld [vmem:[%s2496_s22 + $0x110] sm:$0xff] }
  0xa6   : > { %v685_v31 = vld [vmem:[%s2496_s22 + $0xdc8] sm:$0xff]  ;;  %v1859_v33 = vpack.c.bf16 %v652_v27, %v636_v26  ;;  %v236_v18 = vld [vmem:[#allocation2 + $0x40] sm:$0xff]  ;;  %v294_v25 = vld [vmem:[%s2496_s22 + $0x190] sm:$0xff] }
  0xa7   : > { %v1861_v35 = vpack.c.bf16 %v685_v31, %v669_v30  ;;  %v693_v40 = vld [vmem:[%s2496_s22 + $0xe08] sm:$0xff]  ;;  %v286_v26 = vld [vmem:[%s2496_s22 + $0x150] sm:$0xff]  ;;  %v311_v28 = vld [vmem:[%s2496_s22 + $0x218] sm:$0xff] }
  0xa8   : > { %v709_v41 = vld [vmem:[%s2496_s22 + $0xe88] sm:$0xff]  ;;  %v302_v27 = vld [vmem:[%s2496_s22 + $0x1d0] sm:$0xff]  ;;  %v327_v29 = vld [vmem:[%s2496_s22 + $0x298] sm:$0xff] }
  0xa9   : > { %v701_v42 = vld [vmem:[%s2496_s22 + $0xe48] sm:$0xff]  ;;  %v1609_v46 = vpack.c.bf16 %v709_v41, %v693_v40  ;;  %v319_v30 = vld [vmem:[%s2496_s22 + $0x258] sm:$0xff] }
  0xaa   : > { %1584 = vmatpush1.bf16.xpose.msra.mxu1 %v1583_v36  ;;  %v660_v36 = vld [vmem:[%s2496_s22 + $0xd00] sm:$0xff]  ;;  %v717_v43 = vld [vmem:[%s2496_s22 + $0xec8] sm:$0xff]  ;;  %v335_v31 = vld [vmem:[%s2496_s22 + $0x2d8] sm:$0xff] }
  0xab   : > { %1586 = vmatprep.subr.bf16.mxu1 %v1585_v38  ;;  %v668_v38 = vld [vmem:[%s2496_s22 + $0xd40] sm:$0xff]  ;;  %v1865_v47 = vpack.c.bf16 %v717_v43, %v701_v42  ;;  %v725_v52 = vld [vmem:[%s2496_s22 + $0xf08] sm:$0xff]  ;;  %v343_v40 = vld [vmem:[%s2496_s22 + $0x318] sm:$0xff] }
  0xac   : > { %1840 = vmatpush1.bf16.xpose.msra.mxu0 %v1839_v37  ;;  %v676_v37 = vld [vmem:[%s2496_s22 + $0xd80] sm:$0xff]  ;;  %v741_v53 = vld [vmem:[%s2496_s22 + $0xf88] sm:$0xff]  ;;  %v359_v41 = vld [vmem:[%s2496_s22 + $0x398] sm:$0xff] }
  0xad   : > { %1842 = vmatprep.subr.bf16.mxu0 %v1841_v39  ;;  %v684_v39 = vld [vmem:[%s2496_s22 + $0xdc0] sm:$0xff]  ;;  %v1607_v44 = vpack.c.bf16 %v676_v37, %v660_v36  ;;  %v733_v54 = vld [vmem:[%s2496_s22 + $0xf48] sm:$0xff]  ;;  %v1613_v58 = vpack.c.bf16 %v741_v53, %v725_v52  ;;  %v310_v36 = vld [vmem:[%s2496_s22 + $0x210] sm:$0xff] }
  0xae   : > { %v1863_v45 = vpack.c.bf16 %v684_v39, %v668_v38  ;;  %v749_v55 = vld [vmem:[%s2496_s22 + $0xfc8] sm:$0xff]  ;;  %v326_v37 = vld [vmem:[%s2496_s22 + $0x290] sm:$0xff]  ;;  %v351_v42 = vld [vmem:[%s2496_s22 + $0x358] sm:$0xff] }
  0xaf   : > { %v1869_v59 = vpack.c.bf16 %v749_v55, %v733_v54  ;;  %v318_v38 = vld [vmem:[%s2496_s22 + $0x250] sm:$0xff]  ;;  %v367_v43 = vld [vmem:[%s2496_s22 + $0x3d8] sm:$0xff] }
  0xb0   : > { %v334_v39 = vld [vmem:[%s2496_s22 + $0x2d0] sm:$0xff]  ;;  %v375_v52 = vld [vmem:[%s2496_s22 + $0x418] sm:$0xff] }
  0xb1   : > { %v391_v53 = vld [vmem:[%s2496_s22 + $0x498] sm:$0xff] }
  0xb2   : > { %1588 = vmatpush1.bf16.xpose.msra.mxu1 %v1587_v48  ;;  %v692_v48 = vld [vmem:[%s2496_s22 + $0xe00] sm:$0xff]  ;;  %v383_v54 = vld [vmem:[%s2496_s22 + $0x458] sm:$0xff] }
  0xb3   : > { %1590 = vmatprep.subr.bf16.mxu1 %v1589_v50  ;;  %v700_v50 = vld [vmem:[%s2496_s22 + $0xe40] sm:$0xff]  ;;  %v399_v55 = vld [vmem:[%s2496_s22 + $0x4d8] sm:$0xff] }
  0xb4   : > { %1844 = vmatpush1.bf16.xpose.msra.mxu0 %v1843_v49  ;;  %v708_v49 = vld [vmem:[%s2496_s22 + $0xe80] sm:$0xff] }
  0xb5   : > { %1846 = vmatprep.subr.bf16.mxu0 %v1845_v51  ;;  %v716_v51 = vld [vmem:[%s2496_s22 + $0xec0] sm:$0xff]  ;;  %v1611_v56 = vpack.c.bf16 %v708_v49, %v692_v48  ;;  %v342_v48 = vld [vmem:[%s2496_s22 + $0x310] sm:$0xff] }
  0xb6   : > { %v1867_v57 = vpack.c.bf16 %v716_v51, %v700_v50  ;;  %v358_v49 = vld [vmem:[%s2496_s22 + $0x390] sm:$0xff] }
  0xb7   : > { %v350_v50 = vld [vmem:[%s2496_s22 + $0x350] sm:$0xff] }
  0xb8   : > { %v366_v51 = vld [vmem:[%s2496_s22 + $0x3d0] sm:$0xff] }
  0xba   : > { %1592 = vmatpush1.bf16.xpose.msra.mxu1 %v1591_v60  ;;  %v724_v60 = vld [vmem:[%s2496_s22 + $0xf00] sm:$0xff] }
  0xbb   : > { %1594 = vmatprep.subr.bf16.mxu1 %v1593_v62  ;;  %v732_v62 = vld [vmem:[%s2496_s22 + $0xf40] sm:$0xff] }
  0xbc   : > { %1848 = vmatpush1.bf16.xpose.msra.mxu0 %v1847_v61  ;;  %v740_v61 = vld [vmem:[%s2496_s22 + $0xf80] sm:$0xff] }
  0xbd   : > { %1850 = vmatprep.subr.bf16.mxu0 %v1849_v63  ;;  %v748_v63 = vld [vmem:[%s2496_s22 + $0xfc0] sm:$0xff]  ;;  %v1615_v4 = vpack.c.bf16 %v740_v61, %v724_v60  ;;  %v374_v60 = vld [vmem:[%s2496_s22 + $0x410] sm:$0xff] }
  0xbe   : > { %v1871_v5 = vpack.c.bf16 %v748_v63, %v732_v62  ;;  %v390_v61 = vld [vmem:[%s2496_s22 + $0x490] sm:$0xff] }
  0xbf   : > { %v382_v62 = vld [vmem:[%s2496_s22 + $0x450] sm:$0xff] }
  0xc0   : > { %v398_v63 = vld [vmem:[%s2496_s22 + $0x4d0] sm:$0xff] }
  0xc2   : > { %1596 = vmatpush1.bf16.xpose.msra.mxu1 %v1595_v8  ;;  %v246_v8 = vld [vmem:[%s2496_s22 + $0x10] sm:$0xff] }
  0xc3   : > { %1598 = vmatprep.subr.bf16.mxu1 %v1597_v10  ;;  %v254_v10 = vld [vmem:[%s2496_s22 + $0x50] sm:$0xff] }
  0xc4   : > { %1852 = vmatpush1.bf16.xpose.msra.mxu0 %v1851_v9  ;;  %v262_v9 = vld [vmem:[%s2496_s22 + $0x90] sm:$0xff] }
  0xc5   : > { %1854 = vmatprep.subr.bf16.mxu0 %v1853_v11  ;;  %v270_v11 = vld [vmem:[%s2496_s22 + $0xd0] sm:$0xff]  ;;  %v1619_v17 = vpack.c.bf16 %v262_v9, %v246_v8 }
  0xc6   : > { %v1875_v19 = vpack.c.bf16 %v270_v11, %v254_v10  ;;  %v406_v8 = vld [vmem:[%s2496_s22 + $0x510] sm:$0xff] }
  0xc7   : > { %v422_v9 = vld [vmem:[%s2496_s22 + $0x590] sm:$0xff] }
  0xc8   : > { %v414_v10 = vld [vmem:[%s2496_s22 + $0x550] sm:$0xff] }
  0xc9   : > { %v430_v11 = vld [vmem:[%s2496_s22 + $0x5d0] sm:$0xff] }
  0xca   : > { %1600 = vmatpush1.bf16.xpose.msra.mxu1 %v1599_v20  ;;  %v1621_v20 = vpack.c.bf16 %v295_v13, %v279_v12  ;;  %v439_v12 = vld [vmem:[%s2496_s22 + $0x618] sm:$0xff] }
  0xcb   : > { %1602 = vmatprep.subr.bf16.mxu1 %v1601_v22  ;;  %v231_v22 = vld [vmem:[#allocation2 + $0x18] sm:$0xff] }
  0xcc   : > { %1856 = vmatpush1.bf16.xpose.msra.mxu0 %v1855_v21  ;;  %v1877_v21 = vpack.c.bf16 %v303_v15, %v287_v14  ;;  %v455_v13 = vld [vmem:[%s2496_s22 + $0x698] sm:$0xff] }
  0xcd   : > { %1858 = vmatprep.subr.bf16.mxu0 %v1857_v23  ;;  %v239_v23 = vld [vmem:[#allocation2 + $0x58] sm:$0xff] }
  0xce   : > { %v447_v14 = vld [vmem:[%s2496_s22 + $0x658] sm:$0xff] }
  0xcf   : > { %v463_v15 = vld [vmem:[%s2496_s22 + $0x6d8] sm:$0xff] }
  0xd2   : > { %1604 = vmatpush1.bf16.xpose.msra.mxu1 %v1603_v32  ;;  %v1623_v32 = vpack.c.bf16 %v294_v25, %v278_v24  ;;  %v471_v24 = vld [vmem:[%s2496_s22 + $0x718] sm:$0xff] }
  0xd3   : > { %1606 = vmatprep.subr.bf16.mxu1 %v1605_v34  ;;  %v1625_v34 = vpack.c.bf16 %v327_v29, %v311_v28  ;;  %v487_v25 = vld [vmem:[%s2496_s22 + $0x798] sm:$0xff] }
  0xd4   : > { %1860 = vmatpush1.bf16.xpose.msra.mxu0 %v1859_v33  ;;  %v1879_v33 = vpack.c.bf16 %v302_v27, %v286_v26  ;;  %v479_v26 = vld [vmem:[%s2496_s22 + $0x758] sm:$0xff] }
  0xd5   : > { %1862 = vmatprep.subr.bf16.mxu0 %v1861_v35  ;;  %v1881_v35 = vpack.c.bf16 %v335_v31, %v319_v30  ;;  %v495_v27 = vld [vmem:[%s2496_s22 + $0x7d8] sm:$0xff]  ;;  %v1645_v30 = vpack.c.bf16 %v487_v25, %v471_v24 }
  0xd6   : > { %v1901_v31 = vpack.c.bf16 %v495_v27, %v479_v26 }
  0xda   : > { %1608 = vmatpush1.bf16.xpose.msra.mxu1 %v1607_v44  ;;  %v1627_v44 = vpack.c.bf16 %v326_v37, %v310_v36  ;;  %v503_v36 = vld [vmem:[%s2496_s22 + $0x818] sm:$0xff] }
  0xdb   : > { %1610 = vmatprep.subr.bf16.mxu1 %v1609_v46  ;;  %v1629_v46 = vpack.c.bf16 %v359_v41, %v343_v40  ;;  %v519_v37 = vld [vmem:[%s2496_s22 + $0x898] sm:$0xff] }
  0xdc   : > { %1864 = vmatpush1.bf16.xpose.msra.mxu0 %v1863_v45  ;;  %v1883_v45 = vpack.c.bf16 %v334_v39, %v318_v38  ;;  %v511_v38 = vld [vmem:[%s2496_s22 + $0x858] sm:$0xff] }
  0xdd   : > { %1866 = vmatprep.subr.bf16.mxu0 %v1865_v47  ;;  %v1885_v47 = vpack.c.bf16 %v367_v43, %v351_v42  ;;  %v527_v39 = vld [vmem:[%s2496_s22 + $0x8d8] sm:$0xff]  ;;  %v1649_v42 = vpack.c.bf16 %v519_v37, %v503_v36 }
  0xde   : > { %v1905_v43 = vpack.c.bf16 %v527_v39, %v511_v38 }
  0xe2   : > { %1612 = vmatpush1.bf16.xpose.msra.mxu1 %v1611_v56  ;;  %v1631_v56 = vpack.c.bf16 %v358_v49, %v342_v48  ;;  %v535_v48 = vld [vmem:[%s2496_s22 + $0x918] sm:$0xff] }
  0xe3   : > { %1614 = vmatprep.subr.bf16.mxu1 %v1613_v58  ;;  %v1633_v58 = vpack.c.bf16 %v391_v53, %v375_v52  ;;  %v551_v49 = vld [vmem:[%s2496_s22 + $0x998] sm:$0xff] }
  0xe4   : > { %1868 = vmatpush1.bf16.xpose.msra.mxu0 %v1867_v57  ;;  %v1887_v57 = vpack.c.bf16 %v366_v51, %v350_v50  ;;  %v543_v50 = vld [vmem:[%s2496_s22 + $0x958] sm:$0xff] }
  0xe5   : > { %1870 = vmatprep.subr.bf16.mxu0 %v1869_v59  ;;  %v1889_v59 = vpack.c.bf16 %v399_v55, %v383_v54  ;;  %v559_v51 = vld [vmem:[%s2496_s22 + $0x9d8] sm:$0xff]  ;;  %v1653_v54 = vpack.c.bf16 %v551_v49, %v535_v48 }
  0xe6   : > { %v1909_v55 = vpack.c.bf16 %v559_v51, %v543_v50 }
  0xea   : > { %1616 = vmatpush1.bf16.xpose.msra.mxu1 %v1615_v4  ;;  %v1635_v4 = vpack.c.bf16 %v390_v61, %v374_v60  ;;  %v567_v60 = vld [vmem:[%s2496_s22 + $0xa18] sm:$0xff] }
  0xeb   : > { %1618 = vmatprep.subr.bf16.mxu1 %v1617_v6  ;;  %v1637_v6 = vpack.c.bf16 %v423_v1, %v407_v0  ;;  %v583_v61 = vld [vmem:[%s2496_s22 + $0xa98] sm:$0xff] }
  0xec   : > { %1872 = vmatpush1.bf16.xpose.msra.mxu0 %v1871_v5  ;;  %v1891_v5 = vpack.c.bf16 %v398_v63, %v382_v62  ;;  %v575_v62 = vld [vmem:[%s2496_s22 + $0xa58] sm:$0xff] }
  0xed   : > { %1874 = vmatprep.subr.bf16.mxu0 %v1873_v7  ;;  %v1893_v7 = vpack.c.bf16 %v431_v3, %v415_v2  ;;  %v591_v63 = vld [vmem:[%s2496_s22 + $0xad8] sm:$0xff]  ;;  %v1657_v2 = vpack.c.bf16 %v583_v61, %v567_v60 }
  0xee   : > { %v1913_v3 = vpack.c.bf16 %v591_v63, %v575_v62 }
  0xf1   : > { %833 = vmatmul.mubr.f32.vlgmr.msra.gmra.mrb[0].mxu1 %v228_v16  ;;  %v1639_v16 = vpack.c.bf16 %v422_v9, %v406_v8  ;;  %v599_v8 = vld [vmem:[%s2496_s22 + $0xb18] sm:$0xff] }
  0xf2   : > { %1620 = vmatpush1.bf16.xpose.msra.mxu1 %v1619_v17  ;;  %903 = vmatprep.mubr.f32.mxu1 %v231_v22  ;;  %v1895_v17 = vpack.c.bf16 %v430_v11, %v414_v10  ;;  %v446_v22 = vld [vmem:[%s2496_s22 + $0x650] sm:$0xff]  ;;  %v615_v9 = vld [vmem:[%s2496_s22 + $0xb98] sm:$0xff] }
  0xf3   : > { %1117 = vmatmul.mubr.f32.vlgmr.msra.gmra.mrb[0].mxu0 %v236_v18  ;;  %1622 = vmatprep.subr.bf16.mxu1 %v1621_v20  ;;  %v1641_v18 = vpack.c.bf16 %v455_v13, %v439_v12  ;;  %v438_v20 = vld [vmem:[%s2496_s22 + $0x610] sm:$0xff]  ;;  %v607_v10 = vld [vmem:[%s2496_s22 + $0xb58] sm:$0xff] }
  0xf4   : > { %1876 = vmatpush1.bf16.xpose.msra.mxu0 %v1875_v19  ;;  %1187 = vmatprep.mubr.f32.mxu0 %v239_v23  ;;  %v1897_v19 = vpack.c.bf16 %v463_v15, %v447_v14  ;;  %v462_v23 = vld [vmem:[%s2496_s22 + $0x6d0] sm:$0xff]  ;;  %v623_v11 = vld [vmem:[%s2496_s22 + $0xbd8] sm:$0xff]  ;;  %v1661_v14 = vpack.c.bf16 %v615_v9, %v599_v8 }
  0xf5   : > { %1878 = vmatprep.subr.bf16.mxu0 %v1877_v21  ;;  %v454_v21 = vld [vmem:[%s2496_s22 + $0x690] sm:$0xff]  ;;  %v1899_v29 = vpack.c.bf16 %v462_v23, %v446_v22  ;;  %v1917_v15 = vpack.c.bf16 %v623_v11, %v607_v10  ;;  %v639_v22 = vld [vmem:[%s2496_s22 + $0xc58] sm:$0xff] }
  0xf6   : > { %v1643_v28 = vpack.c.bf16 %v454_v21, %v438_v20  ;;  %v631_v20 = vld [vmem:[%s2496_s22 + $0xc18] sm:$0xff] }
  0xf7   : > { %v647_v21 = vld [vmem:[%s2496_s22 + $0xc98] sm:$0xff] }
  0xf8   : > { %v655_v23 = vld [vmem:[%s2496_s22 + $0xcd8] sm:$0xff]  ;;  %v1665_v26 = vpack.c.bf16 %v647_v21, %v631_v20  ;;  %v230_v20 = vld [vmem:[#allocation2 + $0x10] sm:$0xff] }
  0xf9   : > { %v1921_v27 = vpack.c.bf16 %v655_v23, %v639_v22  ;;  %v238_v22 = vld [vmem:[#allocation2 + $0x50] sm:$0xff] }
  0xfa   : > { %1624 = vmatpush1.bf16.xpose.msra.mxu1 %v1623_v32  ;;  %v470_v32 = vld [vmem:[%s2496_s22 + $0x710] sm:$0xff] }
  0xfb   : > { %1626 = vmatprep.subr.bf16.mxu1 %v1625_v34  ;;  %v478_v34 = vld [vmem:[%s2496_s22 + $0x750] sm:$0xff] }
  0xfc   : > { %1880 = vmatpush1.bf16.xpose.msra.mxu0 %v1879_v33  ;;  %v486_v33 = vld [vmem:[%s2496_s22 + $0x790] sm:$0xff] }
  0xfd   : > { %1882 = vmatprep.subr.bf16.mxu0 %v1881_v35  ;;  %v494_v35 = vld [vmem:[%s2496_s22 + $0x7d0] sm:$0xff]  ;;  %v1647_v40 = vpack.c.bf16 %v486_v33, %v470_v32  ;;  %v663_v32 = vld [vmem:[%s2496_s22 + $0xd18] sm:$0xff] }
  0xfe   : > { %v1903_v41 = vpack.c.bf16 %v494_v35, %v478_v34  ;;  %v679_v33 = vld [vmem:[%s2496_s22 + $0xd98] sm:$0xff] }
  0xff   : > { %v671_v34 = vld [vmem:[%s2496_s22 + $0xd58] sm:$0xff]  ;;  %v1669_v38 = vpack.c.bf16 %v679_v33, %v663_v32  ;;  %v313_v32 = vld [vmem:[%s2496_s22 + $0x228] sm:$0xff] }
 0x100   : > { %v687_v35 = vld [vmem:[%s2496_s22 + $0xdd8] sm:$0xff]  ;;  %v329_v33 = vld [vmem:[%s2496_s22 + $0x2a8] sm:$0xff] }
 0x101   : > { %v1925_v39 = vpack.c.bf16 %v687_v35, %v671_v34  ;;  %v321_v34 = vld [vmem:[%s2496_s22 + $0x268] sm:$0xff] }
 0x102   : > { %1628 = vmatpush1.bf16.xpose.msra.mxu1 %v1627_v44  ;;  %v502_v44 = vld [vmem:[%s2496_s22 + $0x810] sm:$0xff]  ;;  %v337_v35 = vld [vmem:[%s2496_s22 + $0x2e8] sm:$0xff] }
 0x103   : > { %1630 = vmatprep.subr.bf16.mxu1 %v1629_v46  ;;  %v510_v46 = vld [vmem:[%s2496_s22 + $0x850] sm:$0xff] }
 0x104   : > { %1884 = vmatpush1.bf16.xpose.msra.mxu0 %v1883_v45  ;;  %v518_v45 = vld [vmem:[%s2496_s22 + $0x890] sm:$0xff] }
 0x105   : > { %1886 = vmatprep.subr.bf16.mxu0 %v1885_v47  ;;  %v526_v47 = vld [vmem:[%s2496_s22 + $0x8d0] sm:$0xff]  ;;  %v1651_v52 = vpack.c.bf16 %v518_v45, %v502_v44  ;;  %v695_v44 = vld [vmem:[%s2496_s22 + $0xe18] sm:$0xff] }
 0x106   : > { %v1907_v53 = vpack.c.bf16 %v526_v47, %v510_v46  ;;  %v711_v45 = vld [vmem:[%s2496_s22 + $0xe98] sm:$0xff] }
 0x107   : > { %v703_v46 = vld [vmem:[%s2496_s22 + $0xe58] sm:$0xff]  ;;  %v1673_v50 = vpack.c.bf16 %v711_v45, %v695_v44  ;;  %v345_v44 = vld [vmem:[%s2496_s22 + $0x328] sm:$0xff] }
 0x108   : > { %v719_v47 = vld [vmem:[%s2496_s22 + $0xed8] sm:$0xff]  ;;  %v361_v45 = vld [vmem:[%s2496_s22 + $0x3a8] sm:$0xff] }
 0x109   : > { %v1929_v51 = vpack.c.bf16 %v719_v47, %v703_v46  ;;  %v353_v46 = vld [vmem:[%s2496_s22 + $0x368] sm:$0xff] }
 0x10a   : > { %1632 = vmatpush1.bf16.xpose.msra.mxu1 %v1631_v56  ;;  %v534_v56 = vld [vmem:[%s2496_s22 + $0x910] sm:$0xff]  ;;  %v369_v47 = vld [vmem:[%s2496_s22 + $0x3e8] sm:$0xff] }
 0x10b   : > { %1634 = vmatprep.subr.bf16.mxu1 %v1633_v58  ;;  %v542_v58 = vld [vmem:[%s2496_s22 + $0x950] sm:$0xff] }
 0x10c   : > { %1888 = vmatpush1.bf16.xpose.msra.mxu0 %v1887_v57  ;;  %v550_v57 = vld [vmem:[%s2496_s22 + $0x990] sm:$0xff] }
 0x10d   : > { %1890 = vmatprep.subr.bf16.mxu0 %v1889_v59  ;;  %v558_v59 = vld [vmem:[%s2496_s22 + $0x9d0] sm:$0xff]  ;;  %v1655_v0 = vpack.c.bf16 %v550_v57, %v534_v56  ;;  %v727_v56 = vld [vmem:[%s2496_s22 + $0xf18] sm:$0xff] }
 0x10e   : > { %v1911_v1 = vpack.c.bf16 %v558_v59, %v542_v58  ;;  %v743_v57 = vld [vmem:[%s2496_s22 + $0xf98] sm:$0xff] }
 0x10f   : > { %v735_v58 = vld [vmem:[%s2496_s22 + $0xf58] sm:$0xff]  ;;  %v1677_v62 = vpack.c.bf16 %v743_v57, %v727_v56  ;;  %v377_v56 = vld [vmem:[%s2496_s22 + $0x428] sm:$0xff] }
 0x110   : > { %v751_v59 = vld [vmem:[%s2496_s22 + $0xfd8] sm:$0xff]  ;;  %v393_v57 = vld [vmem:[%s2496_s22 + $0x4a8] sm:$0xff] }
 0x111   : > { %v1933_v63 = vpack.c.bf16 %v751_v59, %v735_v58  ;;  %v385_v58 = vld [vmem:[%s2496_s22 + $0x468] sm:$0xff] }
 0x112   : > { %1636 = vmatpush1.bf16.xpose.msra.mxu1 %v1635_v4  ;;  %v566_v4 = vld [vmem:[%s2496_s22 + $0xa10] sm:$0xff]  ;;  %v401_v59 = vld [vmem:[%s2496_s22 + $0x4e8] sm:$0xff] }
 0x113   : > { %1638 = vmatprep.subr.bf16.mxu1 %v1637_v6  ;;  %v574_v6 = vld [vmem:[%s2496_s22 + $0xa50] sm:$0xff] }
 0x114   : > { %1892 = vmatpush1.bf16.xpose.msra.mxu0 %v1891_v5  ;;  %v582_v5 = vld [vmem:[%s2496_s22 + $0xa90] sm:$0xff] }
 0x115   : > { %1894 = vmatprep.subr.bf16.mxu0 %v1893_v7  ;;  %v590_v7 = vld [vmem:[%s2496_s22 + $0xad0] sm:$0xff]  ;;  %v1659_v12 = vpack.c.bf16 %v582_v5, %v566_v4  ;;  %v249_v4 = vld [vmem:[%s2496_s22 + $0x28] sm:$0xff] }
 0x116   : > { %v1915_v13 = vpack.c.bf16 %v590_v7, %v574_v6  ;;  %v265_v5 = vld [vmem:[%s2496_s22 + $0xa8] sm:$0xff] }
 0x117   : > { %v257_v6 = vld [vmem:[%s2496_s22 + $0x68] sm:$0xff]  ;;  %v1681_v10 = vpack.c.bf16 %v265_v5, %v249_v4 }
 0x118   : > { %v273_v7 = vld [vmem:[%s2496_s22 + $0xe8] sm:$0xff] }
 0x119   : > { %v1937_v11 = vpack.c.bf16 %v273_v7, %v257_v6  ;;  %v409_v4 = vld [vmem:[%s2496_s22 + $0x528] sm:$0xff] }
 0x11a   : > { %1640 = vmatpush1.bf16.xpose.msra.mxu1 %v1639_v16  ;;  %v598_v16 = vld [vmem:[%s2496_s22 + $0xb10] sm:$0xff]  ;;  %v425_v5 = vld [vmem:[%s2496_s22 + $0x5a8] sm:$0xff] }
 0x11b   : > { %1642 = vmatprep.subr.bf16.mxu1 %v1641_v18  ;;  %v606_v18 = vld [vmem:[%s2496_s22 + $0xb50] sm:$0xff]  ;;  %v417_v6 = vld [vmem:[%s2496_s22 + $0x568] sm:$0xff] }
 0x11c   : > { %1896 = vmatpush1.bf16.xpose.msra.mxu0 %v1895_v17  ;;  %v614_v17 = vld [vmem:[%s2496_s22 + $0xb90] sm:$0xff]  ;;  %v433_v7 = vld [vmem:[%s2496_s22 + $0x5e8] sm:$0xff] }
 0x11d   : > { %1898 = vmatprep.subr.bf16.mxu0 %v1897_v19  ;;  %v622_v19 = vld [vmem:[%s2496_s22 + $0xbd0] sm:$0xff]  ;;  %v1663_v24 = vpack.c.bf16 %v614_v17, %v598_v16  ;;  %v281_v16 = vld [vmem:[%s2496_s22 + $0x128] sm:$0xff] }
 0x11e   : > { %v1919_v25 = vpack.c.bf16 %v622_v19, %v606_v18  ;;  %v297_v17 = vld [vmem:[%s2496_s22 + $0x1a8] sm:$0xff] }
 0x11f   : > { %v289_v18 = vld [vmem:[%s2496_s22 + $0x168] sm:$0xff] }
 0x120   : > { %v305_v19 = vld [vmem:[%s2496_s22 + $0x1e8] sm:$0xff] }
 0x122   : > { %1644 = vmatpush1.bf16.xpose.msra.mxu1 %v1643_v28  ;;  %v630_v28 = vld [vmem:[%s2496_s22 + $0xc10] sm:$0xff] }
 0x123   : > { %1646 = vmatprep.subr.bf16.mxu1 %v1645_v30  ;;  %v638_v30 = vld [vmem:[%s2496_s22 + $0xc50] sm:$0xff] }
 0x124   : > { %1900 = vmatpush1.bf16.xpose.msra.mxu0 %v1899_v29  ;;  %v646_v29 = vld [vmem:[%s2496_s22 + $0xc90] sm:$0xff] }
 0x125   : > { %1902 = vmatprep.subr.bf16.mxu0 %v1901_v31  ;;  %v654_v31 = vld [vmem:[%s2496_s22 + $0xcd0] sm:$0xff]  ;;  %v1667_v36 = vpack.c.bf16 %v646_v29, %v630_v28  ;;  %v280_v28 = vld [vmem:[%s2496_s22 + $0x120] sm:$0xff] }
 0x126   : > { %v1923_v37 = vpack.c.bf16 %v654_v31, %v638_v30  ;;  %v296_v29 = vld [vmem:[%s2496_s22 + $0x1a0] sm:$0xff] }
 0x127   : > { %v288_v30 = vld [vmem:[%s2496_s22 + $0x160] sm:$0xff] }
 0x128   : > { %v304_v31 = vld [vmem:[%s2496_s22 + $0x1e0] sm:$0xff] }
 0x12a   : > { %1648 = vmatpush1.bf16.xpose.msra.mxu1 %v1647_v40  ;;  %v662_v40 = vld [vmem:[%s2496_s22 + $0xd10] sm:$0xff] }
 0x12b   : > { %1650 = vmatprep.subr.bf16.mxu1 %v1649_v42  ;;  %v670_v42 = vld [vmem:[%s2496_s22 + $0xd50] sm:$0xff] }
 0x12c   : > { %1904 = vmatpush1.bf16.xpose.msra.mxu0 %v1903_v41  ;;  %v678_v41 = vld [vmem:[%s2496_s22 + $0xd90] sm:$0xff] }
 0x12d   : > { %1906 = vmatprep.subr.bf16.mxu0 %v1905_v43  ;;  %v686_v43 = vld [vmem:[%s2496_s22 + $0xdd0] sm:$0xff]  ;;  %v1671_v48 = vpack.c.bf16 %v678_v41, %v662_v40  ;;  %v312_v40 = vld [vmem:[%s2496_s22 + $0x220] sm:$0xff] }
 0x12e   : > { %v1927_v49 = vpack.c.bf16 %v686_v43, %v670_v42  ;;  %v328_v41 = vld [vmem:[%s2496_s22 + $0x2a0] sm:$0xff] }
 0x12f   : > { %v320_v42 = vld [vmem:[%s2496_s22 + $0x260] sm:$0xff] }
 0x130   : > { %v336_v43 = vld [vmem:[%s2496_s22 + $0x2e0] sm:$0xff] }
 0x132   : > { %1652 = vmatpush1.bf16.xpose.msra.mxu1 %v1651_v52  ;;  %v694_v52 = vld [vmem:[%s2496_s22 + $0xe10] sm:$0xff] }
 0x133   : > { %1654 = vmatprep.subr.bf16.mxu1 %v1653_v54  ;;  %v702_v54 = vld [vmem:[%s2496_s22 + $0xe50] sm:$0xff] }
 0x134   : > { %1908 = vmatpush1.bf16.xpose.msra.mxu0 %v1907_v53  ;;  %v710_v53 = vld [vmem:[%s2496_s22 + $0xe90] sm:$0xff] }
 0x135   : > { %1910 = vmatprep.subr.bf16.mxu0 %v1909_v55  ;;  %v718_v55 = vld [vmem:[%s2496_s22 + $0xed0] sm:$0xff]  ;;  %v1675_v60 = vpack.c.bf16 %v710_v53, %v694_v52  ;;  %v344_v52 = vld [vmem:[%s2496_s22 + $0x320] sm:$0xff] }
 0x136   : > { %v1931_v61 = vpack.c.bf16 %v718_v55, %v702_v54  ;;  %v360_v53 = vld [vmem:[%s2496_s22 + $0x3a0] sm:$0xff] }
 0x137   : > { %v352_v54 = vld [vmem:[%s2496_s22 + $0x360] sm:$0xff] }
 0x138   : > { %v368_v55 = vld [vmem:[%s2496_s22 + $0x3e0] sm:$0xff] }
 0x13a   : > { %1656 = vmatpush1.bf16.xpose.msra.mxu1 %v1655_v0  ;;  %v726_v0 = vld [vmem:[%s2496_s22 + $0xf10] sm:$0xff] }
 0x13b   : > { %1658 = vmatprep.subr.bf16.mxu1 %v1657_v2  ;;  %v734_v2 = vld [vmem:[%s2496_s22 + $0xf50] sm:$0xff] }
 0x13c   : > { %1912 = vmatpush1.bf16.xpose.msra.mxu0 %v1911_v1  ;;  %v742_v1 = vld [vmem:[%s2496_s22 + $0xf90] sm:$0xff] }
 0x13d   : > { %1914 = vmatprep.subr.bf16.mxu0 %v1913_v3  ;;  %v750_v3 = vld [vmem:[%s2496_s22 + $0xfd0] sm:$0xff]  ;;  %v1679_v8 = vpack.c.bf16 %v742_v1, %v726_v0  ;;  %v376_v0 = vld [vmem:[%s2496_s22 + $0x420] sm:$0xff] }
 0x13e   : > { %v1935_v9 = vpack.c.bf16 %v750_v3, %v734_v2  ;;  %v392_v1 = vld [vmem:[%s2496_s22 + $0x4a0] sm:$0xff] }
 0x13f   : > { %v384_v2 = vld [vmem:[%s2496_s22 + $0x460] sm:$0xff] }
 0x140   : > { %v400_v3 = vld [vmem:[%s2496_s22 + $0x4e0] sm:$0xff] }
 0x142   : > { %1660 = vmatpush1.bf16.xpose.msra.mxu1 %v1659_v12  ;;  %v248_v12 = vld [vmem:[%s2496_s22 + $0x20] sm:$0xff] }
 0x143   : > { %1662 = vmatprep.subr.bf16.mxu1 %v1661_v14  ;;  %v256_v14 = vld [vmem:[%s2496_s22 + $0x60] sm:$0xff] }
 0x144   : > { %1916 = vmatpush1.bf16.xpose.msra.mxu0 %v1915_v13  ;;  %v264_v13 = vld [vmem:[%s2496_s22 + $0xa0] sm:$0xff] }
 0x145   : > { %1918 = vmatprep.subr.bf16.mxu0 %v1917_v15  ;;  %v272_v15 = vld [vmem:[%s2496_s22 + $0xe0] sm:$0xff]  ;;  %v1683_v21 = vpack.c.bf16 %v264_v13, %v248_v12 }
 0x146   : > { %v1939_v23 = vpack.c.bf16 %v272_v15, %v256_v14  ;;  %v408_v12 = vld [vmem:[%s2496_s22 + $0x520] sm:$0xff] }
 0x147   : > { %v424_v13 = vld [vmem:[%s2496_s22 + $0x5a0] sm:$0xff] }
 0x148   : > { %v416_v14 = vld [vmem:[%s2496_s22 + $0x560] sm:$0xff] }
 0x149   : > { %v432_v15 = vld [vmem:[%s2496_s22 + $0x5e0] sm:$0xff] }
 0x14a   : > { %1664 = vmatpush1.bf16.xpose.msra.mxu1 %v1663_v24  ;;  %v1685_v24 = vpack.c.bf16 %v297_v17, %v281_v16  ;;  %v441_v16 = vld [vmem:[%s2496_s22 + $0x628] sm:$0xff] }
 0x14b   : > { %1666 = vmatprep.subr.bf16.mxu1 %v1665_v26  ;;  %v233_v26 = vld [vmem:[#allocation2 + $0x28] sm:$0xff] }
 0x14c   : > { %1920 = vmatpush1.bf16.xpose.msra.mxu0 %v1919_v25  ;;  %v1941_v25 = vpack.c.bf16 %v305_v19, %v289_v18  ;;  %v457_v17 = vld [vmem:[%s2496_s22 + $0x6a8] sm:$0xff] }
 0x14d   : > { %1922 = vmatprep.subr.bf16.mxu0 %v1921_v27  ;;  %v241_v27 = vld [vmem:[#allocation2 + $0x68] sm:$0xff] }
 0x14e   : > { %v449_v18 = vld [vmem:[%s2496_s22 + $0x668] sm:$0xff] }
 0x14f   : > { %v465_v19 = vld [vmem:[%s2496_s22 + $0x6e8] sm:$0xff] }
 0x152   : > { %1668 = vmatpush1.bf16.xpose.msra.mxu1 %v1667_v36  ;;  %v1687_v36 = vpack.c.bf16 %v296_v29, %v280_v28  ;;  %v473_v28 = vld [vmem:[%s2496_s22 + $0x728] sm:$0xff] }
 0x153   : > { %1670 = vmatprep.subr.bf16.mxu1 %v1669_v38  ;;  %v1689_v38 = vpack.c.bf16 %v329_v33, %v313_v32  ;;  %v489_v29 = vld [vmem:[%s2496_s22 + $0x7a8] sm:$0xff] }
 0x154   : > { %1924 = vmatpush1.bf16.xpose.msra.mxu0 %v1923_v37  ;;  %v1943_v37 = vpack.c.bf16 %v304_v31, %v288_v30  ;;  %v481_v30 = vld [vmem:[%s2496_s22 + $0x768] sm:$0xff] }
 0x155   : > { %1926 = vmatprep.subr.bf16.mxu0 %v1925_v39  ;;  %v1945_v39 = vpack.c.bf16 %v337_v35, %v321_v34  ;;  %v497_v31 = vld [vmem:[%s2496_s22 + $0x7e8] sm:$0xff]  ;;  %v1709_v34 = vpack.c.bf16 %v489_v29, %v473_v28 }
 0x156   : > { %v1965_v35 = vpack.c.bf16 %v497_v31, %v481_v30 }
 0x15a   : > { %1672 = vmatpush1.bf16.xpose.msra.mxu1 %v1671_v48  ;;  %v1691_v48 = vpack.c.bf16 %v328_v41, %v312_v40  ;;  %v505_v40 = vld [vmem:[%s2496_s22 + $0x828] sm:$0xff] }
 0x15b   : > { %1674 = vmatprep.subr.bf16.mxu1 %v1673_v50  ;;  %v1693_v50 = vpack.c.bf16 %v361_v45, %v345_v44  ;;  %v521_v41 = vld [vmem:[%s2496_s22 + $0x8a8] sm:$0xff] }
 0x15c   : > { %1928 = vmatpush1.bf16.xpose.msra.mxu0 %v1927_v49  ;;  %v1947_v49 = vpack.c.bf16 %v336_v43, %v320_v42  ;;  %v513_v42 = vld [vmem:[%s2496_s22 + $0x868] sm:$0xff] }
 0x15d   : > { %1930 = vmatprep.subr.bf16.mxu0 %v1929_v51  ;;  %v1949_v51 = vpack.c.bf16 %v369_v47, %v353_v46  ;;  %v529_v43 = vld [vmem:[%s2496_s22 + $0x8e8] sm:$0xff]  ;;  %v1713_v46 = vpack.c.bf16 %v521_v41, %v505_v40 }
 0x15e   : > { %v1969_v47 = vpack.c.bf16 %v529_v43, %v513_v42 }
 0x162   : > { %1676 = vmatpush1.bf16.xpose.msra.mxu1 %v1675_v60  ;;  %v1695_v60 = vpack.c.bf16 %v360_v53, %v344_v52  ;;  %v537_v52 = vld [vmem:[%s2496_s22 + $0x928] sm:$0xff] }
 0x163   : > { %1678 = vmatprep.subr.bf16.mxu1 %v1677_v62  ;;  %v1697_v62 = vpack.c.bf16 %v393_v57, %v377_v56  ;;  %v553_v53 = vld [vmem:[%s2496_s22 + $0x9a8] sm:$0xff] }
 0x164   : > { %1932 = vmatpush1.bf16.xpose.msra.mxu0 %v1931_v61  ;;  %v1951_v61 = vpack.c.bf16 %v368_v55, %v352_v54  ;;  %v545_v54 = vld [vmem:[%s2496_s22 + $0x968] sm:$0xff] }
 0x165   : > { %1934 = vmatprep.subr.bf16.mxu0 %v1933_v63  ;;  %v1953_v63 = vpack.c.bf16 %v401_v59, %v385_v58  ;;  %v561_v55 = vld [vmem:[%s2496_s22 + $0x9e8] sm:$0xff]  ;;  %v1717_v58 = vpack.c.bf16 %v553_v53, %v537_v52 }
 0x166   : > { %v1973_v59 = vpack.c.bf16 %v561_v55, %v545_v54 }
 0x16a   : > { %1680 = vmatpush1.bf16.xpose.msra.mxu1 %v1679_v8  ;;  %v1699_v8 = vpack.c.bf16 %v392_v1, %v376_v0  ;;  %v569_v0 = vld [vmem:[%s2496_s22 + $0xa28] sm:$0xff] }
 0x16b   : > { %1682 = vmatprep.subr.bf16.mxu1 %v1681_v10  ;;  %v1701_v10 = vpack.c.bf16 %v425_v5, %v409_v4  ;;  %v585_v1 = vld [vmem:[%s2496_s22 + $0xaa8] sm:$0xff] }
 0x16c   : > { %1936 = vmatpush1.bf16.xpose.msra.mxu0 %v1935_v9  ;;  %v1955_v9 = vpack.c.bf16 %v400_v3, %v384_v2  ;;  %v577_v2 = vld [vmem:[%s2496_s22 + $0xa68] sm:$0xff] }
 0x16d   : > { %1938 = vmatprep.subr.bf16.mxu0 %v1937_v11  ;;  %v1957_v11 = vpack.c.bf16 %v433_v7, %v417_v6  ;;  %v593_v3 = vld [vmem:[%s2496_s22 + $0xae8] sm:$0xff]  ;;  %v1721_v6 = vpack.c.bf16 %v585_v1, %v569_v0 }
 0x16e   : > { %v1977_v7 = vpack.c.bf16 %v593_v3, %v577_v2 }
 0x171   : > { %904 = vmatmul.mubr.f32.vlgmr.msra.gmra.mrb[0].mxu1 %v230_v20  ;;  %v1703_v20 = vpack.c.bf16 %v424_v13, %v408_v12  ;;  %v601_v12 = vld [vmem:[%s2496_s22 + $0xb28] sm:$0xff] }
 0x172   : > { %1684 = vmatpush1.bf16.xpose.msra.mxu1 %v1683_v21  ;;  %974 = vmatprep.mubr.f32.mxu1 %v233_v26  ;;  %v1959_v21 = vpack.c.bf16 %v432_v15, %v416_v14  ;;  %v448_v26 = vld [vmem:[%s2496_s22 + $0x660] sm:$0xff]  ;;  %v617_v13 = vld [vmem:[%s2496_s22 + $0xba8] sm:$0xff] }
 0x173   : > { %1188 = vmatmul.mubr.f32.vlgmr.msra.gmra.mrb[0].mxu0 %v238_v22  ;;  %1686 = vmatprep.subr.bf16.mxu1 %v1685_v24  ;;  %v1705_v22 = vpack.c.bf16 %v457_v17, %v441_v16  ;;  %v440_v24 = vld [vmem:[%s2496_s22 + $0x620] sm:$0xff]  ;;  %v609_v14 = vld [vmem:[%s2496_s22 + $0xb68] sm:$0xff] }
 0x174   : > { %1940 = vmatpush1.bf16.xpose.msra.mxu0 %v1939_v23  ;;  %1258 = vmatprep.mubr.f32.mxu0 %v241_v27  ;;  %v1961_v23 = vpack.c.bf16 %v465_v19, %v449_v18  ;;  %v464_v27 = vld [vmem:[%s2496_s22 + $0x6e0] sm:$0xff]  ;;  %v625_v15 = vld [vmem:[%s2496_s22 + $0xbe8] sm:$0xff]  ;;  %v1725_v18 = vpack.c.bf16 %v617_v13, %v601_v12 }
 0x175   : > { %1942 = vmatprep.subr.bf16.mxu0 %v1941_v25  ;;  %v456_v25 = vld [vmem:[%s2496_s22 + $0x6a0] sm:$0xff]  ;;  %v1963_v33 = vpack.c.bf16 %v464_v27, %v448_v26  ;;  %v1981_v19 = vpack.c.bf16 %v625_v15, %v609_v14  ;;  %v641_v26 = vld [vmem:[%s2496_s22 + $0xc68] sm:$0xff] }
 0x176   : > { %v1707_v32 = vpack.c.bf16 %v456_v25, %v440_v24  ;;  %v633_v24 = vld [vmem:[%s2496_s22 + $0xc28] sm:$0xff] }
 0x177   : > { %v649_v25 = vld [vmem:[%s2496_s22 + $0xca8] sm:$0xff] }
 0x178   : > { %v657_v27 = vld [vmem:[%s2496_s22 + $0xce8] sm:$0xff]  ;;  %v1729_v30 = vpack.c.bf16 %v649_v25, %v633_v24  ;;  %v232_v24 = vld [vmem:[#allocation2 + $0x20] sm:$0xff] }
 0x179   : > { %v1985_v31 = vpack.c.bf16 %v657_v27, %v641_v26  ;;  %v240_v26 = vld [vmem:[#allocation2 + $0x60] sm:$0xff] }
 0x17a   : > { %1688 = vmatpush1.bf16.xpose.msra.mxu1 %v1687_v36  ;;  %v472_v36 = vld [vmem:[%s2496_s22 + $0x720] sm:$0xff] }
 0x17b   : > { %1690 = vmatprep.subr.bf16.mxu1 %v1689_v38  ;;  %v480_v38 = vld [vmem:[%s2496_s22 + $0x760] sm:$0xff] }
 0x17c   : > { %1944 = vmatpush1.bf16.xpose.msra.mxu0 %v1943_v37  ;;  %v488_v37 = vld [vmem:[%s2496_s22 + $0x7a0] sm:$0xff] }
 0x17d   : > { %1946 = vmatprep.subr.bf16.mxu0 %v1945_v39  ;;  %v496_v39 = vld [vmem:[%s2496_s22 + $0x7e0] sm:$0xff]  ;;  %v1711_v44 = vpack.c.bf16 %v488_v37, %v472_v36  ;;  %v665_v36 = vld [vmem:[%s2496_s22 + $0xd28] sm:$0xff] }
 0x17e   : > { %v1967_v45 = vpack.c.bf16 %v496_v39, %v480_v38  ;;  %v681_v37 = vld [vmem:[%s2496_s22 + $0xda8] sm:$0xff] }
 0x17f   : > { %v673_v38 = vld [vmem:[%s2496_s22 + $0xd68] sm:$0xff]  ;;  %v1733_v42 = vpack.c.bf16 %v681_v37, %v665_v36  ;;  %v315_v36 = vld [vmem:[%s2496_s22 + $0x238] sm:$0xff] }
 0x180   : > { %v689_v39 = vld [vmem:[%s2496_s22 + $0xde8] sm:$0xff]  ;;  %v331_v37 = vld [vmem:[%s2496_s22 + $0x2b8] sm:$0xff] }
 0x181   : > { %v1989_v43 = vpack.c.bf16 %v689_v39, %v673_v38  ;;  %v323_v38 = vld [vmem:[%s2496_s22 + $0x278] sm:$0xff] }
 0x182   : > { %1692 = vmatpush1.bf16.xpose.msra.mxu1 %v1691_v48  ;;  %v504_v48 = vld [vmem:[%s2496_s22 + $0x820] sm:$0xff]  ;;  %v339_v39 = vld [vmem:[%s2496_s22 + $0x2f8] sm:$0xff] }
 0x183   : > { %1694 = vmatprep.subr.bf16.mxu1 %v1693_v50  ;;  %v512_v50 = vld [vmem:[%s2496_s22 + $0x860] sm:$0xff] }
 0x184   : > { %1948 = vmatpush1.bf16.xpose.msra.mxu0 %v1947_v49  ;;  %v520_v49 = vld [vmem:[%s2496_s22 + $0x8a0] sm:$0xff] }
 0x185   : > { %1950 = vmatprep.subr.bf16.mxu0 %v1949_v51  ;;  %v528_v51 = vld [vmem:[%s2496_s22 + $0x8e0] sm:$0xff]  ;;  %v1715_v56 = vpack.c.bf16 %v520_v49, %v504_v48  ;;  %v697_v48 = vld [vmem:[%s2496_s22 + $0xe28] sm:$0xff] }
 0x186   : > { %v1971_v57 = vpack.c.bf16 %v528_v51, %v512_v50  ;;  %v713_v49 = vld [vmem:[%s2496_s22 + $0xea8] sm:$0xff] }
 0x187   : > { %v705_v50 = vld [vmem:[%s2496_s22 + $0xe68] sm:$0xff]  ;;  %v1737_v54 = vpack.c.bf16 %v713_v49, %v697_v48  ;;  %v347_v48 = vld [vmem:[%s2496_s22 + $0x338] sm:$0xff] }
 0x188   : > { %v721_v51 = vld [vmem:[%s2496_s22 + $0xee8] sm:$0xff]  ;;  %v363_v49 = vld [vmem:[%s2496_s22 + $0x3b8] sm:$0xff] }
 0x189   : > { %v1993_v55 = vpack.c.bf16 %v721_v51, %v705_v50  ;;  %v355_v50 = vld [vmem:[%s2496_s22 + $0x378] sm:$0xff] }
 0x18a   : > { %1696 = vmatpush1.bf16.xpose.msra.mxu1 %v1695_v60  ;;  %v536_v60 = vld [vmem:[%s2496_s22 + $0x920] sm:$0xff]  ;;  %v371_v51 = vld [vmem:[%s2496_s22 + $0x3f8] sm:$0xff] }
 0x18b   : > { %1698 = vmatprep.subr.bf16.mxu1 %v1697_v62  ;;  %v544_v62 = vld [vmem:[%s2496_s22 + $0x960] sm:$0xff] }
 0x18c   : > { %1952 = vmatpush1.bf16.xpose.msra.mxu0 %v1951_v61  ;;  %v552_v61 = vld [vmem:[%s2496_s22 + $0x9a0] sm:$0xff] }
 0x18d   : > { %1954 = vmatprep.subr.bf16.mxu0 %v1953_v63  ;;  %v560_v63 = vld [vmem:[%s2496_s22 + $0x9e0] sm:$0xff]  ;;  %v1719_v4 = vpack.c.bf16 %v552_v61, %v536_v60  ;;  %v729_v60 = vld [vmem:[%s2496_s22 + $0xf28] sm:$0xff] }
 0x18e   : > { %v1975_v5 = vpack.c.bf16 %v560_v63, %v544_v62  ;;  %v745_v61 = vld [vmem:[%s2496_s22 + $0xfa8] sm:$0xff] }
 0x18f   : > { %v737_v62 = vld [vmem:[%s2496_s22 + $0xf68] sm:$0xff]  ;;  %v1741_v2 = vpack.c.bf16 %v745_v61, %v729_v60  ;;  %v379_v60 = vld [vmem:[%s2496_s22 + $0x438] sm:$0xff] }
 0x190   : > { %v753_v63 = vld [vmem:[%s2496_s22 + $0xfe8] sm:$0xff]  ;;  %v395_v61 = vld [vmem:[%s2496_s22 + $0x4b8] sm:$0xff] }
 0x191   : > { %v1997_v3 = vpack.c.bf16 %v753_v63, %v737_v62  ;;  %v387_v62 = vld [vmem:[%s2496_s22 + $0x478] sm:$0xff] }
 0x192   : > { %1700 = vmatpush1.bf16.xpose.msra.mxu1 %v1699_v8  ;;  %v568_v8 = vld [vmem:[%s2496_s22 + $0xa20] sm:$0xff]  ;;  %v403_v63 = vld [vmem:[%s2496_s22 + $0x4f8] sm:$0xff] }
 0x193   : > { %1702 = vmatprep.subr.bf16.mxu1 %v1701_v10  ;;  %v576_v10 = vld [vmem:[%s2496_s22 + $0xa60] sm:$0xff] }
 0x194   : > { %1956 = vmatpush1.bf16.xpose.msra.mxu0 %v1955_v9  ;;  %v584_v9 = vld [vmem:[%s2496_s22 + $0xaa0] sm:$0xff] }
 0x195   : > { %1958 = vmatprep.subr.bf16.mxu0 %v1957_v11  ;;  %v592_v11 = vld [vmem:[%s2496_s22 + $0xae0] sm:$0xff]  ;;  %v1723_v16 = vpack.c.bf16 %v584_v9, %v568_v8  ;;  %v251_v8 = vld [vmem:[%s2496_s22 + $0x38] sm:$0xff] }
 0x196   : > { %v1979_v17 = vpack.c.bf16 %v592_v11, %v576_v10  ;;  %v267_v9 = vld [vmem:[%s2496_s22 + $0xb8] sm:$0xff] }
 0x197   : > { %v259_v10 = vld [vmem:[%s2496_s22 + $0x78] sm:$0xff]  ;;  %v1745_v14 = vpack.c.bf16 %v267_v9, %v251_v8 }
 0x198   : > { %v275_v11 = vld [vmem:[%s2496_s22 + $0xf8] sm:$0xff] }
 0x199   : > { %v2001_v15 = vpack.c.bf16 %v275_v11, %v259_v10  ;;  %v411_v8 = vld [vmem:[%s2496_s22 + $0x538] sm:$0xff] }
 0x19a   : > { %1704 = vmatpush1.bf16.xpose.msra.mxu1 %v1703_v20  ;;  %v600_v20 = vld [vmem:[%s2496_s22 + $0xb20] sm:$0xff]  ;;  %v427_v9 = vld [vmem:[%s2496_s22 + $0x5b8] sm:$0xff] }
 0x19b   : > { %1706 = vmatprep.subr.bf16.mxu1 %v1705_v22  ;;  %v608_v22 = vld [vmem:[%s2496_s22 + $0xb60] sm:$0xff]  ;;  %v419_v10 = vld [vmem:[%s2496_s22 + $0x578] sm:$0xff] }
 0x19c   : > { %1960 = vmatpush1.bf16.xpose.msra.mxu0 %v1959_v21  ;;  %v616_v21 = vld [vmem:[%s2496_s22 + $0xba0] sm:$0xff]  ;;  %v435_v11 = vld [vmem:[%s2496_s22 + $0x5f8] sm:$0xff] }
 0x19d   : > { %1962 = vmatprep.subr.bf16.mxu0 %v1961_v23  ;;  %v624_v23 = vld [vmem:[%s2496_s22 + $0xbe0] sm:$0xff]  ;;  %v1727_v28 = vpack.c.bf16 %v616_v21, %v600_v20  ;;  %v283_v20 = vld [vmem:[%s2496_s22 + $0x138] sm:$0xff] }
 0x19e   : > { %v1983_v29 = vpack.c.bf16 %v624_v23, %v608_v22  ;;  %v299_v21 = vld [vmem:[%s2496_s22 + $0x1b8] sm:$0xff] }
 0x19f   : > { %v291_v22 = vld [vmem:[%s2496_s22 + $0x178] sm:$0xff] }
 0x1a0   : > { %v307_v23 = vld [vmem:[%s2496_s22 + $0x1f8] sm:$0xff] }
 0x1a2   : > { %1708 = vmatpush1.bf16.xpose.msra.mxu1 %v1707_v32  ;;  %v632_v32 = vld [vmem:[%s2496_s22 + $0xc20] sm:$0xff] }
 0x1a3   : > { %1710 = vmatprep.subr.bf16.mxu1 %v1709_v34  ;;  %v640_v34 = vld [vmem:[%s2496_s22 + $0xc60] sm:$0xff] }
 0x1a4   : > { %1964 = vmatpush1.bf16.xpose.msra.mxu0 %v1963_v33  ;;  %v648_v33 = vld [vmem:[%s2496_s22 + $0xca0] sm:$0xff] }
 0x1a5   : > { %1966 = vmatprep.subr.bf16.mxu0 %v1965_v35  ;;  %v656_v35 = vld [vmem:[%s2496_s22 + $0xce0] sm:$0xff]  ;;  %v1731_v40 = vpack.c.bf16 %v648_v33, %v632_v32  ;;  %v282_v32 = vld [vmem:[%s2496_s22 + $0x130] sm:$0xff] }
 0x1a6   : > { %v1987_v41 = vpack.c.bf16 %v656_v35, %v640_v34  ;;  %v298_v33 = vld [vmem:[%s2496_s22 + $0x1b0] sm:$0xff] }
 0x1a7   : > { %v290_v34 = vld [vmem:[%s2496_s22 + $0x170] sm:$0xff] }
 0x1a8   : > { %v306_v35 = vld [vmem:[%s2496_s22 + $0x1f0] sm:$0xff] }
 0x1aa   : > { %1712 = vmatpush1.bf16.xpose.msra.mxu1 %v1711_v44  ;;  %v664_v44 = vld [vmem:[%s2496_s22 + $0xd20] sm:$0xff] }
 0x1ab   : > { %1714 = vmatprep.subr.bf16.mxu1 %v1713_v46  ;;  %v672_v46 = vld [vmem:[%s2496_s22 + $0xd60] sm:$0xff] }
 0x1ac   : > { %1968 = vmatpush1.bf16.xpose.msra.mxu0 %v1967_v45  ;;  %v680_v45 = vld [vmem:[%s2496_s22 + $0xda0] sm:$0xff] }
 0x1ad   : > { %1970 = vmatprep.subr.bf16.mxu0 %v1969_v47  ;;  %v688_v47 = vld [vmem:[%s2496_s22 + $0xde0] sm:$0xff]  ;;  %v1735_v52 = vpack.c.bf16 %v680_v45, %v664_v44  ;;  %v314_v44 = vld [vmem:[%s2496_s22 + $0x230] sm:$0xff] }
 0x1ae   : > { %v1991_v53 = vpack.c.bf16 %v688_v47, %v672_v46  ;;  %v330_v45 = vld [vmem:[%s2496_s22 + $0x2b0] sm:$0xff] }
 0x1af   : > { %v322_v46 = vld [vmem:[%s2496_s22 + $0x270] sm:$0xff] }
 0x1b0   : > { %v338_v47 = vld [vmem:[%s2496_s22 + $0x2f0] sm:$0xff] }
 0x1b2   : > { %1716 = vmatpush1.bf16.xpose.msra.mxu1 %v1715_v56  ;;  %v696_v56 = vld [vmem:[%s2496_s22 + $0xe20] sm:$0xff] }
 0x1b3   : > { %1718 = vmatprep.subr.bf16.mxu1 %v1717_v58  ;;  %v704_v58 = vld [vmem:[%s2496_s22 + $0xe60] sm:$0xff] }
 0x1b4   : > { %1972 = vmatpush1.bf16.xpose.msra.mxu0 %v1971_v57  ;;  %v712_v57 = vld [vmem:[%s2496_s22 + $0xea0] sm:$0xff] }
 0x1b5   : > { %1974 = vmatprep.subr.bf16.mxu0 %v1973_v59  ;;  %v720_v59 = vld [vmem:[%s2496_s22 + $0xee0] sm:$0xff]  ;;  %v1739_v0 = vpack.c.bf16 %v712_v57, %v696_v56  ;;  %v346_v56 = vld [vmem:[%s2496_s22 + $0x330] sm:$0xff] }
 0x1b6   : > { %v1995_v1 = vpack.c.bf16 %v720_v59, %v704_v58  ;;  %v362_v57 = vld [vmem:[%s2496_s22 + $0x3b0] sm:$0xff] }
 0x1b7   : > { %v354_v58 = vld [vmem:[%s2496_s22 + $0x370] sm:$0xff] }
 0x1b8   : > { %v370_v59 = vld [vmem:[%s2496_s22 + $0x3f0] sm:$0xff] }
 0x1ba   : > { %1720 = vmatpush1.bf16.xpose.msra.mxu1 %v1719_v4  ;;  %v728_v4 = vld [vmem:[%s2496_s22 + $0xf20] sm:$0xff] }
 0x1bb   : > { %1722 = vmatprep.subr.bf16.mxu1 %v1721_v6  ;;  %v736_v6 = vld [vmem:[%s2496_s22 + $0xf60] sm:$0xff] }
 0x1bc   : > { %1976 = vmatpush1.bf16.xpose.msra.mxu0 %v1975_v5  ;;  %v744_v5 = vld [vmem:[%s2496_s22 + $0xfa0] sm:$0xff] }
 0x1bd   : > { %1978 = vmatprep.subr.bf16.mxu0 %v1977_v7  ;;  %v752_v7 = vld [vmem:[%s2496_s22 + $0xfe0] sm:$0xff]  ;;  %v1743_v12 = vpack.c.bf16 %v744_v5, %v728_v4  ;;  %v378_v4 = vld [vmem:[%s2496_s22 + $0x430] sm:$0xff] }
 0x1be   : > { %v1999_v13 = vpack.c.bf16 %v752_v7, %v736_v6  ;;  %v394_v5 = vld [vmem:[%s2496_s22 + $0x4b0] sm:$0xff] }
 0x1bf   : > { %v386_v6 = vld [vmem:[%s2496_s22 + $0x470] sm:$0xff] }
 0x1c0   : > { %v402_v7 = vld [vmem:[%s2496_s22 + $0x4f0] sm:$0xff] }
 0x1c2   : > { %1724 = vmatpush1.bf16.xpose.msra.mxu1 %v1723_v16  ;;  %v250_v16 = vld [vmem:[%s2496_s22 + $0x30] sm:$0xff] }
 0x1c3   : > { %1726 = vmatprep.subr.bf16.mxu1 %v1725_v18  ;;  %v258_v18 = vld [vmem:[%s2496_s22 + $0x70] sm:$0xff] }
 0x1c4   : > { %1980 = vmatpush1.bf16.xpose.msra.mxu0 %v1979_v17  ;;  %v266_v17 = vld [vmem:[%s2496_s22 + $0xb0] sm:$0xff] }
 0x1c5   : > { %1982 = vmatprep.subr.bf16.mxu0 %v1981_v19  ;;  %v274_v19 = vld [vmem:[%s2496_s22 + $0xf0] sm:$0xff]  ;;  %v1747_v25 = vpack.c.bf16 %v266_v17, %v250_v16 }
 0x1c6   : > { %v2003_v27 = vpack.c.bf16 %v274_v19, %v258_v18  ;;  %v410_v16 = vld [vmem:[%s2496_s22 + $0x530] sm:$0xff] }
 0x1c7   : > { %v426_v17 = vld [vmem:[%s2496_s22 + $0x5b0] sm:$0xff] }
 0x1c8   : > { %v418_v18 = vld [vmem:[%s2496_s22 + $0x570] sm:$0xff] }
 0x1c9   : > { %v434_v19 = vld [vmem:[%s2496_s22 + $0x5f0] sm:$0xff] }
 0x1ca   : > { %1728 = vmatpush1.bf16.xpose.msra.mxu1 %v1727_v28  ;;  %v1749_v28 = vpack.c.bf16 %v299_v21, %v283_v20  ;;  %v443_v20 = vld [vmem:[%s2496_s22 + $0x638] sm:$0xff] }
 0x1cb   : > { %1730 = vmatprep.subr.bf16.mxu1 %v1729_v30  ;;  %v235_v30 = vld [vmem:[#allocation2 + $0x38] sm:$0xff] }
 0x1cc   : > { %1984 = vmatpush1.bf16.xpose.msra.mxu0 %v1983_v29  ;;  %v2005_v29 = vpack.c.bf16 %v307_v23, %v291_v22  ;;  %v459_v21 = vld [vmem:[%s2496_s22 + $0x6b8] sm:$0xff] }
 0x1cd   : > { %1986 = vmatprep.subr.bf16.mxu0 %v1985_v31  ;;  %v243_v31 = vld [vmem:[#allocation2 + $0x78] sm:$0xff] }
 0x1ce   : > { %v451_v22 = vld [vmem:[%s2496_s22 + $0x678] sm:$0xff] }
 0x1cf   : > { %v467_v23 = vld [vmem:[%s2496_s22 + $0x6f8] sm:$0xff] }
 0x1d2   : > { %1732 = vmatpush1.bf16.xpose.msra.mxu1 %v1731_v40  ;;  %v1751_v40 = vpack.c.bf16 %v298_v33, %v282_v32  ;;  %v475_v32 = vld [vmem:[%s2496_s22 + $0x738] sm:$0xff] }
 0x1d3   : > { %1734 = vmatprep.subr.bf16.mxu1 %v1733_v42  ;;  %v1753_v42 = vpack.c.bf16 %v331_v37, %v315_v36  ;;  %v491_v33 = vld [vmem:[%s2496_s22 + $0x7b8] sm:$0xff] }
 0x1d4   : > { %1988 = vmatpush1.bf16.xpose.msra.mxu0 %v1987_v41  ;;  %v2007_v41 = vpack.c.bf16 %v306_v35, %v290_v34  ;;  %v483_v34 = vld [vmem:[%s2496_s22 + $0x778] sm:$0xff] }
 0x1d5   : > { %1990 = vmatprep.subr.bf16.mxu0 %v1989_v43  ;;  %v2009_v43 = vpack.c.bf16 %v339_v39, %v323_v38  ;;  %v499_v35 = vld [vmem:[%s2496_s22 + $0x7f8] sm:$0xff]  ;;  %v1773_v38 = vpack.c.bf16 %v491_v33, %v475_v32 }
 0x1d6   : > { %v2029_v39 = vpack.c.bf16 %v499_v35, %v483_v34 }
 0x1da   : > { %1736 = vmatpush1.bf16.xpose.msra.mxu1 %v1735_v52  ;;  %v1755_v52 = vpack.c.bf16 %v330_v45, %v314_v44  ;;  %v507_v44 = vld [vmem:[%s2496_s22 + $0x838] sm:$0xff] }
 0x1db   : > { %1738 = vmatprep.subr.bf16.mxu1 %v1737_v54  ;;  %v1757_v54 = vpack.c.bf16 %v363_v49, %v347_v48  ;;  %v523_v45 = vld [vmem:[%s2496_s22 + $0x8b8] sm:$0xff] }
 0x1dc   : > { %1992 = vmatpush1.bf16.xpose.msra.mxu0 %v1991_v53  ;;  %v2011_v53 = vpack.c.bf16 %v338_v47, %v322_v46  ;;  %v515_v46 = vld [vmem:[%s2496_s22 + $0x878] sm:$0xff] }
 0x1dd   : > { %1994 = vmatprep.subr.bf16.mxu0 %v1993_v55  ;;  %v2013_v55 = vpack.c.bf16 %v371_v51, %v355_v50  ;;  %v531_v47 = vld [vmem:[%s2496_s22 + $0x8f8] sm:$0xff]  ;;  %v1777_v50 = vpack.c.bf16 %v523_v45, %v507_v44 }
 0x1de   : > { %v2033_v51 = vpack.c.bf16 %v531_v47, %v515_v46 }
 0x1e2   : > { %1740 = vmatpush1.bf16.xpose.msra.mxu1 %v1739_v0  ;;  %v1759_v0 = vpack.c.bf16 %v362_v57, %v346_v56  ;;  %v539_v56 = vld [vmem:[%s2496_s22 + $0x938] sm:$0xff] }
 0x1e3   : > { %1742 = vmatprep.subr.bf16.mxu1 %v1741_v2  ;;  %v1761_v2 = vpack.c.bf16 %v395_v61, %v379_v60  ;;  %v555_v57 = vld [vmem:[%s2496_s22 + $0x9b8] sm:$0xff] }
 0x1e4   : > { %1996 = vmatpush1.bf16.xpose.msra.mxu0 %v1995_v1  ;;  %v2015_v1 = vpack.c.bf16 %v370_v59, %v354_v58  ;;  %v547_v58 = vld [vmem:[%s2496_s22 + $0x978] sm:$0xff] }
 0x1e5   : > { %1998 = vmatprep.subr.bf16.mxu0 %v1997_v3  ;;  %v2017_v3 = vpack.c.bf16 %v403_v63, %v387_v62  ;;  %v563_v59 = vld [vmem:[%s2496_s22 + $0x9f8] sm:$0xff]  ;;  %v1781_v62 = vpack.c.bf16 %v555_v57, %v539_v56 }
 0x1e6   : > { %v2037_v63 = vpack.c.bf16 %v563_v59, %v547_v58 }
 0x1ea   : > { %1744 = vmatpush1.bf16.xpose.msra.mxu1 %v1743_v12  ;;  %v1763_v12 = vpack.c.bf16 %v394_v5, %v378_v4  ;;  %v571_v4 = vld [vmem:[%s2496_s22 + $0xa38] sm:$0xff] }
 0x1eb   : > { %1746 = vmatprep.subr.bf16.mxu1 %v1745_v14  ;;  %v1765_v14 = vpack.c.bf16 %v427_v9, %v411_v8  ;;  %v587_v5 = vld [vmem:[%s2496_s22 + $0xab8] sm:$0xff] }
 0x1ec   : > { %2000 = vmatpush1.bf16.xpose.msra.mxu0 %v1999_v13  ;;  %v2019_v13 = vpack.c.bf16 %v402_v7, %v386_v6  ;;  %v579_v6 = vld [vmem:[%s2496_s22 + $0xa78] sm:$0xff] }
 0x1ed   : > { %2002 = vmatprep.subr.bf16.mxu0 %v2001_v15  ;;  %v2021_v15 = vpack.c.bf16 %v435_v11, %v419_v10  ;;  %v595_v7 = vld [vmem:[%s2496_s22 + $0xaf8] sm:$0xff]  ;;  %v1785_v10 = vpack.c.bf16 %v587_v5, %v571_v4 }
 0x1ee   : > { %v2041_v11 = vpack.c.bf16 %v595_v7, %v579_v6 }
 0x1f1   : > { %975 = vmatmul.mubr.f32.vlgmr.msra.gmra.mrb[0].mxu1 %v232_v24  ;;  %v1767_v24 = vpack.c.bf16 %v426_v17, %v410_v16  ;;  %v603_v16 = vld [vmem:[%s2496_s22 + $0xb38] sm:$0xff] }
 0x1f2   : > { %1748 = vmatpush1.bf16.xpose.msra.mxu1 %v1747_v25  ;;  %1045 = vmatprep.mubr.f32.mxu1 %v235_v30  ;;  %v2023_v25 = vpack.c.bf16 %v434_v19, %v418_v18  ;;  %v450_v30 = vld [vmem:[%s2496_s22 + $0x670] sm:$0xff]  ;;  %v619_v17 = vld [vmem:[%s2496_s22 + $0xbb8] sm:$0xff] }
 0x1f3   : > { %1259 = vmatmul.mubr.f32.vlgmr.msra.gmra.mrb[0].mxu0 %v240_v26  ;;  %1750 = vmatprep.subr.bf16.mxu1 %v1749_v28  ;;  %v1769_v26 = vpack.c.bf16 %v459_v21, %v443_v20  ;;  %v442_v28 = vld [vmem:[%s2496_s22 + $0x630] sm:$0xff]  ;;  %v611_v18 = vld [vmem:[%s2496_s22 + $0xb78] sm:$0xff] }
 0x1f4   : > { %2004 = vmatpush1.bf16.xpose.msra.mxu0 %v2003_v27  ;;  %1329 = vmatprep.mubr.f32.mxu0 %v243_v31  ;;  %v2025_v27 = vpack.c.bf16 %v467_v23, %v451_v22  ;;  %v466_v31 = vld [vmem:[%s2496_s22 + $0x6f0] sm:$0xff]  ;;  %v627_v19 = vld [vmem:[%s2496_s22 + $0xbf8] sm:$0xff]  ;;  %v1789_v22 = vpack.c.bf16 %v619_v17, %v603_v16  ;;  %v758_v16 = vlaneseq }
 0x1f5   : > { %2006 = vmatprep.subr.bf16.mxu0 %v2005_v29  ;;  %v458_v29 = vld [vmem:[%s2496_s22 + $0x6b0] sm:$0xff]  ;;  %v2027_v37 = vpack.c.bf16 %v466_v31, %v450_v30  ;;  %v2045_v23 = vpack.c.bf16 %v627_v19, %v611_v18  ;;  %v643_v30 = vld [vmem:[%s2496_s22 + $0xc78] sm:$0xff]  ;;  %v756_v19 = vld [vmem:[%s203_s25] sm:$0x3] }
 0x1f6   : > { %v1771_v36 = vpack.c.bf16 %v458_v29, %v442_v28  ;;  %v635_v28 = vld [vmem:[%s2496_s22 + $0xc38] sm:$0xff]  ;;  %v759_v17 = vshrl.u32 %v758_v16, 7 }
 0x1f7   : > { %v651_v29 = vld [vmem:[%s2496_s22 + $0xcb8] sm:$0xff] }
 0x1f8   : > { %v659_v31 = vld [vmem:[%s2496_s22 + $0xcf8] sm:$0xff]  ;;  %v1793_v34 = vpack.c.bf16 %v651_v29, %v635_v28  ;;  %v760_v18 = vsub.s32 0, %v759_v17 }
 0x1f9   : > { %v2049_v35 = vpack.c.bf16 %v659_v31, %v643_v30 }
 0x1fa   : > { %1752 = vmatpush1.bf16.xpose.msra.mxu1 %v1751_v40  ;;  %v474_v40 = vld [vmem:[%s2496_s22 + $0x730] sm:$0xff] }
 0x1fb   : > { %1754 = vmatprep.subr.bf16.mxu1 %v1753_v42  ;;  %v482_v42 = vld [vmem:[%s2496_s22 + $0x770] sm:$0xff] }
 0x1fc   : > { %2008 = vmatpush1.bf16.xpose.msra.mxu0 %v2007_v41  ;;  %v490_v41 = vld [vmem:[%s2496_s22 + $0x7b0] sm:$0xff] }
 0x1fd   : > { %2010 = vmatprep.subr.bf16.mxu0 %v2009_v43  ;;  %v498_v43 = vld [vmem:[%s2496_s22 + $0x7f0] sm:$0xff]  ;;  %v1775_v48 = vpack.c.bf16 %v490_v41, %v474_v40  ;;  %v667_v40 = vld [vmem:[%s2496_s22 + $0xd38] sm:$0xff] }
 0x1fe   : > { %v2031_v49 = vpack.c.bf16 %v498_v43, %v482_v42  ;;  %v683_v41 = vld [vmem:[%s2496_s22 + $0xdb8] sm:$0xff] }
 0x1ff   : > { %v675_v42 = vld [vmem:[%s2496_s22 + $0xd78] sm:$0xff]  ;;  %v1797_v46 = vpack.c.bf16 %v683_v41, %v667_v40 }
 0x200   : > { %v691_v43 = vld [vmem:[%s2496_s22 + $0xdf8] sm:$0xff] }
 0x201   : > { %v2053_v47 = vpack.c.bf16 %v691_v43, %v675_v42 }
 0x202   : > { %1756 = vmatpush1.bf16.xpose.msra.mxu1 %v1755_v52  ;;  %v506_v52 = vld [vmem:[%s2496_s22 + $0x830] sm:$0xff] }
 0x203   : > { %1758 = vmatprep.subr.bf16.mxu1 %v1757_v54  ;;  %v514_v54 = vld [vmem:[%s2496_s22 + $0x870] sm:$0xff] }
 0x204   : > { %2012 = vmatpush1.bf16.xpose.msra.mxu0 %v2011_v53  ;;  %v522_v53 = vld [vmem:[%s2496_s22 + $0x8b0] sm:$0xff] }
 0x205   : > { %2014 = vmatprep.subr.bf16.mxu0 %v2013_v55  ;;  %v530_v55 = vld [vmem:[%s2496_s22 + $0x8f0] sm:$0xff]  ;;  %v1779_v60 = vpack.c.bf16 %v522_v53, %v506_v52  ;;  %v699_v52 = vld [vmem:[%s2496_s22 + $0xe38] sm:$0xff] }
 0x206   : > { %v2035_v61 = vpack.c.bf16 %v530_v55, %v514_v54  ;;  %v715_v53 = vld [vmem:[%s2496_s22 + $0xeb8] sm:$0xff] }
 0x207   : > { %v707_v54 = vld [vmem:[%s2496_s22 + $0xe78] sm:$0xff]  ;;  %v1801_v58 = vpack.c.bf16 %v715_v53, %v699_v52 }
 0x208   : > { %v723_v55 = vld [vmem:[%s2496_s22 + $0xef8] sm:$0xff] }
 0x209   : > { %v2057_v59 = vpack.c.bf16 %v723_v55, %v707_v54 }
 0x20a   : > { %1760 = vmatpush1.bf16.xpose.msra.mxu1 %v1759_v0  ;;  %v538_v0 = vld [vmem:[%s2496_s22 + $0x930] sm:$0xff] }
 0x20b   : > { %1762 = vmatprep.subr.bf16.mxu1 %v1761_v2  ;;  %v546_v2 = vld [vmem:[%s2496_s22 + $0x970] sm:$0xff] }
 0x20c   : > { %2016 = vmatpush1.bf16.xpose.msra.mxu0 %v2015_v1  ;;  %v554_v1 = vld [vmem:[%s2496_s22 + $0x9b0] sm:$0xff] }
 0x20d   : > { %2018 = vmatprep.subr.bf16.mxu0 %v2017_v3  ;;  %v562_v3 = vld [vmem:[%s2496_s22 + $0x9f0] sm:$0xff]  ;;  %v1783_v8 = vpack.c.bf16 %v554_v1, %v538_v0  ;;  %v731_v0 = vld [vmem:[%s2496_s22 + $0xf38] sm:$0xff] }
 0x20e   : > { %v2039_v9 = vpack.c.bf16 %v562_v3, %v546_v2  ;;  %v747_v1 = vld [vmem:[%s2496_s22 + $0xfb8] sm:$0xff] }
 0x20f   : > { %v739_v2 = vld [vmem:[%s2496_s22 + $0xf78] sm:$0xff]  ;;  %v1805_v6 = vpack.c.bf16 %v747_v1, %v731_v0 }
 0x210   : > { %v755_v3 = vld [vmem:[%s2496_s22 + $0xff8] sm:$0xff] }
 0x211   : > { %v2061_v7 = vpack.c.bf16 %v755_v3, %v739_v2 }
 0x212   : > { %1764 = vmatpush1.bf16.xpose.msra.mxu1 %v1763_v12  ;;  %v570_v12 = vld [vmem:[%s2496_s22 + $0xa30] sm:$0xff] }
 0x213   : > { %1766 = vmatprep.subr.bf16.mxu1 %v1765_v14  ;;  %v578_v14 = vld [vmem:[%s2496_s22 + $0xa70] sm:$0xff] }
 0x214   : > { %2020 = vmatpush1.bf16.xpose.msra.mxu0 %v2019_v13  ;;  %v586_v13 = vld [vmem:[%s2496_s22 + $0xab0] sm:$0xff] }
 0x215   : > { %2022 = vmatprep.subr.bf16.mxu0 %v2021_v15  ;;  %v594_v15 = vld [vmem:[%s2496_s22 + $0xaf0] sm:$0xff]  ;;  %v1787_v20 = vpack.c.bf16 %v586_v13, %v570_v12 }
 0x216   : > { %v2043_v21 = vpack.c.bf16 %v594_v15, %v578_v14  ;;  %v234_v14 = vld [vmem:[#allocation2 + $0x30] sm:$0xff] }
 0x217   : > { %v242_v15 = vld [vmem:[#allocation2 + $0x70] sm:$0xff] }
 0x21a   : > { %1768 = vmatpush1.bf16.xpose.msra.mxu1 %v1767_v24  ;;  %v602_v24 = vld [vmem:[%s2496_s22 + $0xb30] sm:$0xff] }
 0x21b   : > { %1770 = vmatprep.subr.bf16.mxu1 %v1769_v26  ;;  %v610_v26 = vld [vmem:[%s2496_s22 + $0xb70] sm:$0xff] }
 0x21c   : > { %2024 = vmatpush1.bf16.xpose.msra.mxu0 %v2023_v25  ;;  %v618_v25 = vld [vmem:[%s2496_s22 + $0xbb0] sm:$0xff] }
 0x21d   : > { %2026 = vmatprep.subr.bf16.mxu0 %v2025_v27  ;;  %v626_v27 = vld [vmem:[%s2496_s22 + $0xbf0] sm:$0xff]  ;;  %v1791_v32 = vpack.c.bf16 %v618_v25, %v602_v24 }
 0x21e   : > { %v2047_v33 = vpack.c.bf16 %v626_v27, %v610_v26 }
 0x222   : > { %1772 = vmatpush1.bf16.xpose.msra.mxu1 %v1771_v36  ;;  %v634_v36 = vld [vmem:[%s2496_s22 + $0xc30] sm:$0xff] }
 0x223   : > { %1774 = vmatprep.subr.bf16.mxu1 %v1773_v38  ;;  %v642_v38 = vld [vmem:[%s2496_s22 + $0xc70] sm:$0xff] }
 0x224   : > { %2028 = vmatpush1.bf16.xpose.msra.mxu0 %v2027_v37  ;;  %v650_v37 = vld [vmem:[%s2496_s22 + $0xcb0] sm:$0xff] }
 0x225   : > { %2030 = vmatprep.subr.bf16.mxu0 %v2029_v39  ;;  %v658_v39 = vld [vmem:[%s2496_s22 + $0xcf0] sm:$0xff]  ;;  %v1795_v44 = vpack.c.bf16 %v650_v37, %v634_v36 }
 0x226   : > { %v2051_v45 = vpack.c.bf16 %v658_v39, %v642_v38 }
 0x22a   : > { %1776 = vmatpush1.bf16.xpose.msra.mxu1 %v1775_v48  ;;  %v666_v48 = vld [vmem:[%s2496_s22 + $0xd30] sm:$0xff] }
 0x22b   : > { %1778 = vmatprep.subr.bf16.mxu1 %v1777_v50  ;;  %v674_v50 = vld [vmem:[%s2496_s22 + $0xd70] sm:$0xff] }
 0x22c   : > { %2032 = vmatpush1.bf16.xpose.msra.mxu0 %v2031_v49  ;;  %v682_v49 = vld [vmem:[%s2496_s22 + $0xdb0] sm:$0xff] }
 0x22d   : > { %2034 = vmatprep.subr.bf16.mxu0 %v2033_v51  ;;  %v690_v51 = vld [vmem:[%s2496_s22 + $0xdf0] sm:$0xff]  ;;  %v1799_v56 = vpack.c.bf16 %v682_v49, %v666_v48 }
 0x22e   : > { %v2055_v57 = vpack.c.bf16 %v690_v51, %v674_v50 }
 0x232   : > { %1780 = vmatpush1.bf16.xpose.msra.mxu1 %v1779_v60  ;;  %v698_v60 = vld [vmem:[%s2496_s22 + $0xe30] sm:$0xff] }
 0x233   : > { %1782 = vmatprep.subr.bf16.mxu1 %v1781_v62  ;;  %v706_v62 = vld [vmem:[%s2496_s22 + $0xe70] sm:$0xff] }
 0x234   : > { %2036 = vmatpush1.bf16.xpose.msra.mxu0 %v2035_v61  ;;  %v714_v61 = vld [vmem:[%s2496_s22 + $0xeb0] sm:$0xff] }
 0x235   : > { %2038 = vmatprep.subr.bf16.mxu0 %v2037_v63  ;;  %v722_v63 = vld [vmem:[%s2496_s22 + $0xef0] sm:$0xff]  ;;  %v1803_v4 = vpack.c.bf16 %v714_v61, %v698_v60 }
 0x236   : > { %v2059_v5 = vpack.c.bf16 %v722_v63, %v706_v62 }
 0x23a   : > { %1784 = vmatpush1.bf16.xpose.msra.mxu1 %v1783_v8  ;;  %v730_v8 = vld [vmem:[%s2496_s22 + $0xf30] sm:$0xff] }
 0x23b   : > { %1786 = vmatprep.subr.bf16.mxu1 %v1785_v10  ;;  %v738_v10 = vld [vmem:[%s2496_s22 + $0xf70] sm:$0xff] }
 0x23c   : > { %2040 = vmatpush1.bf16.xpose.msra.mxu0 %v2039_v9  ;;  %v746_v9 = vld [vmem:[%s2496_s22 + $0xfb0] sm:$0xff] }
 0x23d   : > { %2042 = vmatprep.subr.bf16.mxu0 %v2041_v11  ;;  %v754_v11 = vld [vmem:[%s2496_s22 + $0xff0] sm:$0xff]  ;;  %v1807_v12 = vpack.c.bf16 %v746_v9, %v730_v8 }
 0x23e   : > { %v2063_v13 = vpack.c.bf16 %v754_v11, %v738_v10 }
 0x242   : > { %1788 = vmatpush1.bf16.xpose.msra.mxu1 %v1787_v20  ;;  %v764_v20 = vsub.s32 1, %v759_v17 }
 0x243   : > { %1790 = vmatprep.subr.bf16.mxu1 %v1789_v22 }
 0x244   : > { %2044 = vmatpush1.bf16.xpose.msra.mxu0 %v2043_v21  ;;  %v761_v21 = vrot.slane %v756_v19, %v760_v18  ;;  %v765_v22 = vrot.slane %v756_v19, %v764_v20 }
 0x245   : > { %2046 = vmatprep.subr.bf16.mxu0 %v2045_v23 }
 0x24a   : > { %1792 = vmatpush1.bf16.xpose.msra.mxu1 %v1791_v32 }
 0x24b   : > { %1794 = vmatprep.subr.bf16.mxu1 %v1793_v34 }
 0x24c   : > { %2048 = vmatpush1.bf16.xpose.msra.mxu0 %v2047_v33 }
 0x24d   : > { %2050 = vmatprep.subr.bf16.mxu0 %v2049_v35 }
 0x252   : > { %1796 = vmatpush1.bf16.xpose.msra.mxu1 %v1795_v44 }
 0x253   : > { %1798 = vmatprep.subr.bf16.mxu1 %v1797_v46 }
 0x254   : > { %2052 = vmatpush1.bf16.xpose.msra.mxu0 %v2051_v45 }
 0x255   : > { %2054 = vmatprep.subr.bf16.mxu0 %v2053_v47 }
 0x25a   : > { %1800 = vmatpush1.bf16.xpose.msra.mxu1 %v1799_v56 }
 0x25b   : > { %1802 = vmatprep.subr.bf16.mxu1 %v1801_v58 }
 0x25c   : > { %2056 = vmatpush1.bf16.xpose.msra.mxu0 %v2055_v57 }
 0x25d   : > { %2058 = vmatprep.subr.bf16.mxu0 %v2057_v59 }
 0x262   : > { %1804 = vmatpush1.bf16.xpose.msra.mxu1 %v1803_v4 }
 0x263   : > { %1806 = vmatprep.subr.bf16.mxu1 %v1805_v6 }
 0x264   : > { %2060 = vmatpush1.bf16.xpose.msra.mxu0 %v2059_v5 }
 0x265   : > { %2062 = vmatprep.subr.bf16.mxu0 %v2061_v7 }
 0x26a   : > { %1808 = vmatpush1.bf16.xpose.msra.mxu1 %v1807_v12 }
 0x26c   : > { %2064 = vmatpush1.bf16.xpose.msra.mxu0 %v2063_v13 }
 0x271   : > { %1046 = vmatmul.mubr.f32.vlgmr.msra.gmra.mrb[0].mxu1 %v234_v14 }
 0x273   : > { %1330 = vmatmul.mubr.f32.vlgmr.msra.gmra.mrb[0].mxu0 %v242_v15 }
 0x344   : > { %v1047_v23 = vpop.f32.mrb[0].mxu1  ;;  %1346 = sbr.rel (%p1545_p2) target bundleno = 1063 (0x427), region = 48 }
 0x345   : > { %v2065_v24 = vadd.f32 %v1047_v23, %v761_v21  ;;  %v1049_v26 = vpop.f32.mrb[1].mxu1 }
 0x346   : > { %v1331_v25 = vpop.f32.mrb[0].mxu0  ;;  %v2067_v27 = vadd.f32 %v1049_v26, %v765_v22 }
 0x347   : > { %v1333_v28 = vpop.f32.mrb[1].mxu0  ;;  %v2066_v29 = vadd.f32 %v2065_v24, %v1331_v25 }
 0x348   : > { %v2068_v30 = vadd.f32 %v2067_v27, %v1333_v28 }
 0x349   : > { %1341 = vst [vmem:[%s1340_s26] sm:$0xff] %v2066_v29 }
 0x34a   : > { %1342 = vst [vmem:[%s1340_s26 + $0x8] sm:$0xff] %v2068_v30 }
 0x351   : > { %v1347_v31 = vld [vmem:[#allocation8] sm:$0xff]  ;;  %v1348_v32 = vld [vmem:[#allocation8 + $0x8] sm:$0xff]  ;;  %v1349_v33 = vld [vmem:[#allocation8 + $0x10] sm:$0xff] }
 0x352   : > { %v1350_v34 = vld [vmem:[#allocation8 + $0x18] sm:$0xff]  ;;  %v1363_v35 = vmul.f32 %v1347_v31, %v1347_v31  ;;  %v1364_v36 = vmul.f32 %v1348_v32, %v1348_v32  ;;  %v1365_v37 = vmul.f32 %v1349_v33, %v1349_v33  ;;  %v1351_v38 = vld [vmem:[#allocation8 + $0x20] sm:$0xff]  ;;  %v1352_v41 = vld [vmem:[#allocation8 + $0x28] sm:$0xff] }
 0x353   : > { %v1366_v39 = vmul.f32 %v1350_v34, %v1350_v34  ;;  %v1367_v42 = vmul.f32 %v1351_v38, %v1351_v38  ;;  %v1353_v44 = vld [vmem:[#allocation8 + $0x30] sm:$0xff]  ;;  %v1368_v45 = vmul.f32 %v1352_v41, %v1352_v41  ;;  %v1354_v47 = vld [vmem:[#allocation8 + $0x38] sm:$0xff]  ;;  %v1355_v50 = vld [vmem:[#allocation8 + $0x40] sm:$0xff] }
 0x354   : > { %v1379_v40 = vadd.f32 %v1364_v36, %v1363_v35  ;;  %v1369_v48 = vmul.f32 %v1353_v44, %v1353_v44  ;;  %v1370_v51 = vmul.f32 %v1354_v47, %v1354_v47  ;;  %v1356_v53 = vld [vmem:[#allocation8 + $0x48] sm:$0xff]  ;;  %v1371_v54 = vmul.f32 %v1355_v50, %v1355_v50  ;;  %v1357_v56 = vld [vmem:[#allocation8 + $0x50] sm:$0xff]  ;;  %v1358_v59 = vld [vmem:[#allocation8 + $0x58] sm:$0xff] }
 0x355   : > { %v1372_v57 = vmul.f32 %v1356_v53, %v1356_v53  ;;  %v1373_v60 = vmul.f32 %v1357_v56, %v1357_v56  ;;  %v1359_v62 = vld [vmem:[#allocation8 + $0x60] sm:$0xff]  ;;  %v1374_v63 = vmul.f32 %v1358_v59, %v1358_v59  ;;  %v1360_v1 = vld [vmem:[#allocation8 + $0x68] sm:$0xff]  ;;  %v1361_v4 = vld [vmem:[#allocation8 + $0x70] sm:$0xff] }
 0x356   : > { %v1380_v43 = vadd.f32 %v1379_v40, %v1365_v37  ;;  %v1375_v2 = vmul.f32 %v1359_v62, %v1359_v62  ;;  %v1376_v5 = vmul.f32 %v1360_v1, %v1360_v1  ;;  %v1362_v7 = vld [vmem:[#allocation8 + $0x78] sm:$0xff]  ;;  %v1377_v8 = vmul.f32 %v1361_v4, %v1361_v4 }
 0x357   : > { %v1378_v10 = vmul.f32 %v1362_v7, %v1362_v7 }
 0x358   : > { %v1381_v46 = vadd.f32 %v1380_v43, %v1366_v39 }
 0x35a   : > { %v1382_v49 = vadd.f32 %v1381_v46, %v1367_v42 }
 0x35c   : > { %v1383_v52 = vadd.f32 %v1382_v49, %v1368_v45 }
 0x35e   : > { %v1384_v55 = vadd.f32 %v1383_v52, %v1369_v48 }
 0x360   : > { %v1385_v58 = vadd.f32 %v1384_v55, %v1370_v51 }
 0x362   : > { %v1386_v61 = vadd.f32 %v1385_v58, %v1371_v54 }
 0x364   : > { %v1387_v0 = vadd.f32 %v1386_v61, %v1372_v57 }
 0x366   : > { %v1388_v3 = vadd.f32 %v1387_v0, %v1373_v60 }
 0x368   : > { %v1389_v6 = vadd.f32 %v1388_v3, %v1374_v63 }
 0x36a   : > { %v1390_v9 = vadd.f32 %v1389_v6, %v1375_v2 }
 0x36c   : > { %v1391_v11 = vadd.f32 %v1390_v9, %v1376_v5 }
 0x36e   : > { %v1392_v12 = vadd.f32 %v1391_v11, %v1377_v8 }
 0x370   : > { %v1393_v13 = vadd.f32 %v1392_v12, %v1378_v10 }
 0x372   : > { %1394 = vadd.xlane.f32.xlu0 %v1393_v13 }
 0x3ff   : > { %v1395_v14 = vpop.xlane.xlu0 %1394 }
 0x400   : > { %2145 = vrsqrt.f32 %v1395_v14  ;;  %vm1398_vm0 = vcmp.eq.f32.partialorder %v1395_v14, inf  ;;  %v1401_v17 = vand.u32 2147483648, %v1395_v14  ;;  %vm1400_vm1 = vcmp.eq.f32.partialorder %v1395_v14, 0.0 }
 0x40a   : > { %v2146_v15 = vpop.eup %2145 }
 0x40b   : > { %v1397_v16 = vmul.f32 %v2146_v15, %v1395_v14 }
 0x40d   : > { %v1399_v18 = vsel %vm1398_vm0, %v1395_v14, %v1397_v16 }
 0x40e   : > { %v1402_v19 = vsel %vm1400_vm1, %v1401_v17, %v1399_v18 }
 0x40f   : > { %v1403_v20 = vmax.f32 %v1402_v19, 1e-12 }
 0x411   : > { %2147 = vrcp.f32 %v1403_v20 }
 0x41b   : > { %v2148_v21 = vpop.eup %2147 }
 0x41c   : > { %v1405_v22 = vmul.f32 %v2148_v21, %v1347_v31  ;;  %v1406_v23 = vmul.f32 %v2148_v21, %v1348_v32  ;;  %v1407_v24 = vmul.f32 %v2148_v21, %v1349_v33  ;;  %v1408_v25 = vmul.f32 %v2148_v21, %v1350_v34 }
 0x41d   : > { %v1409_v26 = vmul.f32 %v2148_v21, %v1351_v38  ;;  %v1410_v27 = vmul.f32 %v2148_v21, %v1352_v41  ;;  %v1411_v28 = vmul.f32 %v2148_v21, %v1353_v44  ;;  %v1412_v29 = vmul.f32 %v2148_v21, %v1354_v47 }
 0x41e   : > { %v1413_v30 = vmul.f32 %v2148_v21, %v1355_v50  ;;  %v1414_v35 = vmul.f32 %v2148_v21, %v1356_v53  ;;  %v1415_v36 = vmul.f32 %v2148_v21, %v1357_v56  ;;  %v1416_v37 = vmul.f32 %v2148_v21, %v1358_v59  ;;  %1421 = vst [vmem:[#allocation8] sm:$0xff] %v1405_v22 }
 0x41f   : > { %1422 = vst [vmem:[#allocation8 + $0x8] sm:$0xff] %v1406_v23  ;;  %1423 = vst [vmem:[#allocation8 + $0x10] sm:$0xff] %v1407_v24  ;;  %v1417_v39 = vmul.f32 %v2148_v21, %v1359_v62  ;;  %v1418_v40 = vmul.f32 %v2148_v21, %v1360_v1  ;;  %v1419_v42 = vmul.f32 %v2148_v21, %v1361_v4 }
 0x420   : > { %1424 = vst [vmem:[#allocation8 + $0x18] sm:$0xff] %v1408_v25  ;;  %v1420_v43 = vmul.f32 %v2148_v21, %v1362_v7  ;;  %1425 = vst [vmem:[#allocation8 + $0x20] sm:$0xff] %v1409_v26 }
 0x421   : > { %1426 = vst [vmem:[#allocation8 + $0x28] sm:$0xff] %v1410_v27  ;;  %1427 = vst [vmem:[#allocation8 + $0x30] sm:$0xff] %v1411_v28 }
 0x422   : > { %1428 = vst [vmem:[#allocation8 + $0x38] sm:$0xff] %v1412_v29  ;;  %1429 = vst [vmem:[#allocation8 + $0x40] sm:$0xff] %v1413_v30 }
 0x423   : > { %1430 = vst [vmem:[#allocation8 + $0x48] sm:$0xff] %v1414_v35  ;;  %1431 = vst [vmem:[#allocation8 + $0x50] sm:$0xff] %v1415_v36 }
 0x424   : > { %1432 = vst [vmem:[#allocation8 + $0x58] sm:$0xff] %v1416_v37  ;;  %1433 = vst [vmem:[#allocation8 + $0x60] sm:$0xff] %v1417_v39 }
 0x425   : > { %1434 = vst [vmem:[#allocation8 + $0x68] sm:$0xff] %v1418_v40  ;;  %1435 = vst [vmem:[#allocation8 + $0x70] sm:$0xff] %v1419_v42 }
 0x426   : > { %1436 = vst [vmem:[#allocation8 + $0x78] sm:$0xff] %v1420_v43 }
 0x427 PF: > { %p2107_p13 = scmp.eq.s32.totalorder %s2411_s23, 7  ;;  %s2312_s28 = smov [#allocation8]  }
 0x428   : > { %s1444_s4 = sshll.u32 %s2312_s28, 4  ;;  %s1445_s4 = int_to_ptr.vmem [resolvable:$true] %s1444_s4 }
 0x429   : > { %s2237_s12 = scalar_lea.vmem %s1445_s4, 2048  ;;  %p2244_p6 = scmp.lt.s32.totalorder %s1445_s4, %s1445_s4 }
 0x42a   : > { %p2238_p4 = scmp.ne.s32.totalorder %s1445_s4, %s2237_s12  ;;  %p2245_p10 = scmp.lt.s32.totalorder %s2237_s12, %s2237_s12 }
 0x42c   : > { %p2239_p0 = pnand %p2238_p4, %p2107_p13  ;;  %p2246_p11 = por %p2245_p10, %p2244_p6 }
 0x42e   : > { %p2240_p3 = pneg %p2239_p0 }
 0x430   : > { %p2247_p5 = pnand %p2246_p11, %p2240_p3 }
 0x432   : > { %2250 = shalt.err (!%p2247_p5)
}
 0x433   : > { %s2251_s6 = scalar_lea.hbm %s3057_s3, 2048 }
 0x434   : > { %p2252_p7 = scmp.ne.s32.totalorder %s3057_s3, %s2251_s6  ;;  %p2257_p1 = scmp.lt.u32.totalorder %s2251_s6, %s3057_s3 }
 0x436   : > { %p2253_p12 = pnand %p2252_p7, %p2107_p13 }
 0x438   : > { %p2254_p9 = pneg %p2253_p12 }
 0x43a   : > { %p2259_p8 = pnand %p2257_p1, %p2254_p9 }
 0x43c   : > { %2262 = shalt.err (!%p2259_p8)
}
 0x43d   : > { %2090 = dma.vmem_to_hbm [thread:$0]  (%p2107_p13), %s1445_s4, 2048, %s3057_s3, [#allocation4]  }
 0x43e   : > { %2288 = dma.done.wait (%p2107_p13), [#allocation4], 2048  }
 0x43f   : > { %2290 = vsyncadd (%p2107_p13), [#allocation4], 4294965248 }
 0x440 PF: > { %p15_p2 = scmp.ge.s32.totalorder %s2354_s16, 10   ;;  %s3075_s12 = smov %s2297_s13 }
 0x441   : > { %s3076_s13 = smov %s2301_s14  ;;  %s3077_s14 = smov %s2364_s19 }
 0x442   : > { %s3078_s15 = smov %s2354_s16  ;;  %17 = sbr.rel (!%p15_p2) target bundleno = 5 (0x5), region = 90 }
 0x449   :  { %1457 = vsyncpa [#allocation3], 1 }
 0x44a   :  { %1459 = vsyncpa [#allocation3 + $0x1], 1 }
 0x44b   :  { %1460 = vsyncpa [#allocation6], 1 }
 0x44c   :  { %1462 = vsyncpa [#allocation6 + $0x1], 1 }
 0x44d   :  { %1463 = vsyncpa [#allocation4], 1 }
 0x44e   :  { %1465 = vsyncpa [#allocation4 + $0x1], 1 }

</bundles_post_ra>
